<compile_context>
chip_gen: v7x
topology: tpu7x:2x2x1
jax: 0.10.0
libtpu: 0.0.40
codegen_flags: <defaults>
</compile_context>

<pallas_src>
import jax
import jax.numpy as jnp
from jax.experimental import pallas as pl
from jax.experimental.pallas import tpu as pltpu


def vision_trans_encoder_kernel(
    x_ref,                    # (Bt, S, P)  compute-dtype patchified pixels
    w_ep_ref, b_ep_ref,       # (P, E) cdt, (1, E) f32 : folded patch-embed + vision_proj
    w_enc1_ref, b_enc1_ref,   # (E, 5E) cdt, (1, 5E) f32 : [w_m1 | w_t1]
    w_m2_ref, b_m2_ref,       # (2E, E) cdt, (1, E) f32
    w_t2_ref, b_t2_ref,       # (3E, E) cdt, (1, E) f32
    w_qkv_ref, b_qkv_ref,     # (E, 3E) cdt, (1, 3E) f32 : [w_q | w_k | w_v]
    o_ref,                    # (Bt, S, E) f32
):
    Bt, S, P = x_ref.shape
    E = w_ep_ref.shape[1]
    N = Bt * S
    cdt = w_ep_ref.dtype                       # matmul operand dtype
    exact = jnp.dtype(cdt) == jnp.dtype(jnp.float32)

    # Fold batch into the token dim so every token-wise linear is one wide
    # matmul.  x is already in the compute dtype (cast in the wrapper before
    # the DMA), so no in-kernel cast / extra f32 bytes.
    x = x_ref[...].reshape(N, P)

    # Backbone stub (patch embedding) + vision_proj, pre-folded into one matmul.
    # TODO(synk): the pretrained Swin/DINOv2 transformer backbone cannot be
    # reproduced here; its last_hidden_state is stubbed by this deterministic
    # patch-embedding projection.
    feats = (jnp.dot(x, w_ep_ref[...], preferred_element_type=jnp.float32)
             + b_ep_ref[...])                                   # (N, E) f32
    # Residual stored NOW: shortens the live range of the f32 feats tensor to
    # a single matmul (only the bf16 copy below survives into the encoders).
    o_ref[...] = feats.reshape(Bt, S, E).astype(o_ref.dtype)
    feats_c = feats.astype(cdt)

    # Fused first layers of modality_encoder / task_encoder: one (N, 5E) matmul.
    # NOTE(lane alignment): at production sizes E is a multiple of 128, so the
    # :2E / 2E: split below lands on a vreg lane boundary and is a free view.
    h = (jnp.dot(feats_c, w_enc1_ref[...], preferred_element_type=jnp.float32)
         + b_enc1_ref[...])
    h = jnp.maximum(h, 0.0)                                      # ReLU in f32
    hm = h[:, : 2 * E].astype(cdt)                               # (N, 2E)
    ht = h[:, 2 * E:].astype(cdt)                                # (N, 3E)

    u = jax.nn.sigmoid(
        jnp.dot(hm, w_m2_ref[...], preferred_element_type=jnp.float32)
        + b_m2_ref[...])                                         # (N, E) f32
    r = jax.nn.sigmoid(
        jnp.dot(ht, w_t2_ref[...], preferred_element_type=jnp.float32)
        + b_t2_ref[...])                                         # (N, E) f32

    # Shared q/k/v projection: reuse the (E,3E) RHS for two dots instead of
    # materializing a (2N, E) concat of u and r.
    w_qkv = w_qkv_ref[...]
    b_qkv = b_qkv_ref[...]
    qkv_u = (jnp.dot(u.astype(cdt), w_qkv, preferred_element_type=jnp.float32)
             + b_qkv)                                            # (N, 3E) f32
    qkv_r = (jnp.dot(r.astype(cdt), w_qkv, preferred_element_type=jnp.float32)
             + b_qkv)                                            # (N, 3E) f32
    uq, uk, uv = qkv_u[:, :E], qkv_u[:, E:2 * E], qkv_u[:, 2 * E:]
    rq, rk, rv = qkv_r[:, :E], qkv_r[:, E:2 * E], qkv_r[:, 2 * E:]

    def attend(q, k, v):
        # Batched attention; einsum contracts the last axes directly on the MXU
        # (no materialized XLU transpose of k).  Scores are intentionally
        # UNSCALED (the PyTorch module uses raw torch.bmm, no 1/sqrt(E)).
        qb = q.reshape(Bt, S, E).astype(cdt)
        kb = k.reshape(Bt, S, E).astype(cdt)
        vb = v.reshape(Bt, S, E).astype(cdt)
        s = jnp.einsum("bqd,bkd->bqk", qb, kb,
                       preferred_element_type=jnp.float32)       # (Bt, S, S) f32
        m = jnp.max(s, axis=-1, keepdims=True)
        e = jnp.exp(s - m)
        denom = jnp.sum(e, axis=-1, keepdims=True)
        if exact:
            p = e / denom                       # exact path for f32 verification
        else:
            p = e * pl.reciprocal(denom, approx=True)   # EUP, free slot
        # Dropout (p=0.5) on the probabilities is the identity in eval mode.
        # TODO(synk): for S >= ~512 switch to an online-softmax over key tiles
        # so the (Bt,S,S) f32 scores are never materialized (v7x VMEM = 64 MiB),
        # and pad S to the MXU tile (256 on v6e/v7x, 128 on v5e) with key masks.
        return jnp.einsum("bqk,bkd->bqd", p.astype(cdt), vb,
                          preferred_element_type=jnp.float32)    # (Bt, S, E) f32

    ru = attend(uq, rk, rv)
    ur = attend(rq, uk, uv)

    ca = 0.3 * (ru + ur)       # == 0.6 * ((ru + ur) / 2)

    # Residual: cross_attn(img_feats) + img_feats  (feats was stored earlier).
    o_ref[...] = o_ref[...] + ca.astype(o_ref.dtype)


def _default_vmem_limit_bytes():
    # Budget against the *detected* chip's VMEM with headroom; never exceed a
    # v5e/v6e-scale request even if the query over-reports.
    cap = 64 * 1024 * 1024          # conservative default = v7x per-TC VMEM
    try:
        info = pltpu.get_tpu_info()
        cap = int(getattr(info, "vmem_capacity_bytes", cap))
    except Exception:
        pass
    return int(min(cap * 7 // 8, 112 * 1024 * 1024))


def _pick_batch_tile(B, S, rows_target=1024):
    # Target ~rows_target token rows per grid step (bounds the per-step working
    # set: ~N x 12E f32 intermediates plus Bt x S x S scores), while keeping at
    # least 2 grid steps when the batch allows (pipeline depth + v7x megacore).
    bt = max(1, min(B, rows_target // max(S, 1)))
    if B >= 2 and bt > (B + 1) // 2:
        bt = max(1, B // 2)
    while B % bt != 0:
        bt -= 1
    return bt


def vision_trans_encoder(images_nchw, params, *, patch=4, batch_tile=None,
                         compute_dtype=jnp.bfloat16):
    """images_nchw: (B, C, H, W) float32."""
    B, C, H, W = images_nchw.shape
    S = (H // patch) * (W // patch)
    P = C * patch * patch

    cdt = compute_dtype
    f32 = jnp.float32

    # Patchify (glue, plain JAX) and cast to the compute dtype so the largest
    # per-step DMA ships half the bytes on the bf16 path.
    x = images_nchw.reshape(B, C, H // patch, patch, W // patch, patch)
    x = x.transpose(0, 2, 4, 1, 3, 5).reshape(B, S, P).astype(cdt)

    E = params["w_proj"].shape[1]

    # Pre-fold backbone-stub patch embedding with vision_proj (no nonlinearity
    # between them): x @ w_emb @ w_proj == x @ (w_emb @ w_proj).
    w_ep = params["w_emb"].astype(f32) @ params["w_proj"].astype(f32)
    b_ep = (params["b_emb"].astype(f32) @ params["w_proj"].astype(f32)
            + params["b_proj"].astype(f32))
    # Fuse the first layers of modality/task encoders along the output dim.
    w_enc1 = jnp.concatenate([params["w_m1"], params["w_t1"]], axis=1).astype(f32)
    b_enc1 = jnp.concatenate([params["b_m1"], params["b_t1"]], axis=1).astype(f32)
    # Fuse the shared q/k/v projections.
    w_qkv = jnp.concatenate([params["w_q"], params["w_k"], params["w_v"]],
                            axis=1).astype(f32)
    b_qkv = jnp.concatenate([params["b_q"], params["b_k"], params["b_v"]],
                            axis=1).astype(f32)

    weight_args = [
        w_ep.astype(cdt), b_ep,                                   # (P,E),(1,E)
        w_enc1.astype(cdt), b_enc1,                               # (E,5E),(1,5E)
        params["w_m2"].astype(cdt), params["b_m2"].astype(f32),   # (2E,E),(1,E)
        params["w_t2"].astype(cdt), params["b_t2"].astype(f32),   # (3E,E),(1,E)
        w_qkv.astype(cdt), b_qkv,                                 # (E,3E),(1,3E)
    ]

    if batch_tile is None:
        batch_tile = _pick_batch_tile(B, S)
    assert B % batch_tile == 0, "batch must be divisible by batch_tile"
    n_blocks = B // batch_tile

    x_spec = pl.BlockSpec((batch_tile, S, P), lambda b: (b, 0, 0))
    out_spec = pl.BlockSpec((batch_tile, S, E), lambda b: (b, 0, 0))
    vmem_limit = _default_vmem_limit_bytes()

    def build(single_buffer_weights):
        # Weights are constant across the grid (index_map always (0,0)), so
        # they are not re-DMA'd per step; requesting Buffered(1) additionally
        # halves their VMEM footprint (matters at E~768 on v7x's 64 MiB).
        if single_buffer_weights:
            w_specs = [pl.BlockSpec(w.shape, lambda b: (0, 0),
                                    pipeline_mode=pl.Buffered(1))
                       for w in weight_args]
        else:
            w_specs = [pl.BlockSpec(w.shape, lambda b: (0, 0))
                       for w in weight_args]
        return pl.pallas_call(
            vision_trans_encoder_kernel,
            # TODO(synk): emit bf16 output if downstream accepts it (halves the
            # writeback bytes); kept f32 here to match the module's dtype.
            out_shape=jax.ShapeDtypeStruct((B, S, E), jnp.float32),
            grid_spec=pltpu.PrefetchScalarGridSpec(
                num_scalar_prefetch=0,
                grid=(n_blocks,),
                in_specs=[x_spec] + w_specs,
                out_specs=out_spec,
            ),
            compiler_params=pltpu.CompilerParams(
                dimension_semantics=("parallel",),
                vmem_limit_bytes=vmem_limit,
            ),
        )

    try:
        return build(True)(x, *weight_args)
    except Exception:
        # Some jax versions reject pipeline_mode=pl.Buffered(1); fall back to
        # the default (double-buffered, still not re-DMA'd per step).
        return build(False)(x, *weight_args)


def _reference(images_nchw, params, *, patch=4):
    """Pure-JAX f32 reference of the same forward pass (unfused)."""
    B, C, H, W = images_nchw.shape
    x = images_nchw.reshape(B, C, H // patch, patch, W // patch, patch)
    x = x.transpose(0, 2, 4, 1, 3, 5).reshape(B, (H // patch) * (W // patch),
                                              C * patch * patch)

    tokens = x @ params["w_emb"] + params["b_emb"]
    feats = tokens @ params["w_proj"] + params["b_proj"]
    u = jax.nn.sigmoid(jnp.maximum(feats @ params["w_m1"] + params["b_m1"], 0.0)
                       @ params["w_m2"] + params["b_m2"])
    r = jax.nn.sigmoid(jnp.maximum(feats @ params["w_t1"] + params["b_t1"], 0.0)
                       @ params["w_t2"] + params["b_t2"])
    uq = u @ params["w_q"] + params["b_q"]
    uk = u @ params["w_k"] + params["b_k"]
    uv = u @ params["w_v"] + params["b_v"]
    rq = r @ params["w_q"] + params["b_q"]
    rk = r @ params["w_k"] + params["b_k"]
    rv = r @ params["w_v"] + params["b_v"]
    su = jax.nn.softmax(jnp.einsum("bqd,bkd->bqk", uq, rk), axis=-1)
    ru = jnp.einsum("bqk,bkd->bqd", su, rv)
    sr = jax.nn.softmax(jnp.einsum("bqd,bkd->bqk", rq, uk), axis=-1)
    ur = jnp.einsum("bqk,bkd->bqd", sr, uv)
    return 0.6 * ((ru + ur) / 2.0) + feats


def make_params(key, patch_dim, hidden, embed):
    ks = jax.random.split(key, 20)
    s = 0.05

    def w(k, shape):
        return (s * jax.random.normal(k, shape)).astype(jnp.float32)

    return {
        # backbone stub (patch embedding)
        "w_emb": w(ks[0], (patch_dim, hidden)), "b_emb": w(ks[1], (1, hidden)),
        # vision_proj
        "w_proj": w(ks[2], (hidden, embed)), "b_proj": w(ks[3], (1, embed)),
        # modality_encoder: E -> 2E -> E
        "w_m1": w(ks[4], (embed, 2 * embed)), "b_m1": w(ks[5], (1, 2 * embed)),
        "w_m2": w(ks[6], (2 * embed, embed)), "b_m2": w(ks[7], (1, embed)),
        # task_encoder: E -> 3E -> E
        "w_t1": w(ks[8], (embed, 3 * embed)), "b_t1": w(ks[9], (1, 3 * embed)),
        "w_t2": w(ks[10], (3 * embed, embed)), "b_t2": w(ks[11], (1, embed)),
        # q/k/v in_proj
        "w_q": w(ks[12], (embed, embed)), "b_q": w(ks[13], (1, embed)),
        "w_k": w(ks[14], (embed, embed)), "b_k": w(ks[15], (1, embed)),
        "w_v": w(ks[16], (embed, embed)), "b_v": w(ks[17], (1, embed)),
    }


if __name__ == "__main__":
    key = jax.random.PRNGKey(0)
    k_img, k_par = jax.random.split(key)

    B, C, Hi, Wi = 4, 3, 16, 16      # NCHW images
    patch = 4
    hidden = 48                      # backbone hidden_size (stub)
    embed = 32                       # opt.embed_size

    images = jax.random.normal(k_img, (B, C, Hi, Wi), dtype=jnp.float32)
    params = make_params(k_par, C * patch * patch, hidden, embed)

    ref = _reference(images, params, patch=patch)
    S = (Hi // patch) * (Wi // patch)

    # f32 matmul path (exact softmax division): tight check vs the reference.
    out_f32 = jax.block_until_ready(
        vision_trans_encoder(images, params, patch=patch,
                             compute_dtype=jnp.float32))
    assert out_f32.shape == ref.shape == (B, S, embed)
    assert jnp.allclose(out_f32, ref, atol=5e-3, rtol=5e-3), \
        "f32 kernel mismatch vs reference"

    # bf16-matmul path (MXU-native, bf16 input DMA): looser tolerance.
    out_bf16 = jax.block_until_ready(
        vision_trans_encoder(images, params, patch=patch,
                             compute_dtype=jnp.bfloat16))
    assert out_bf16.shape == (B, S, embed)
    assert jnp.allclose(out_bf16, ref, atol=5e-2, rtol=5e-2), \
        "bf16 kernel mismatch vs reference"

    print("KERNEL_OK")
</pallas_src>

<mosaic_0001>
module attributes {stable_mosaic.version = 11 : i64} {
  func.func @vision_trans_encoder_kernel(%arg0: i32, %arg1: memref<2x16x48xf32, #tpu.memory_space<vmem>>, %arg2: memref<48x32xf32, #tpu.memory_space<vmem>>, %arg3: memref<1x32xf32, #tpu.memory_space<vmem>>, %arg4: memref<32x160xf32, #tpu.memory_space<vmem>>, %arg5: memref<1x160xf32, #tpu.memory_space<vmem>>, %arg6: memref<64x32xf32, #tpu.memory_space<vmem>>, %arg7: memref<1x32xf32, #tpu.memory_space<vmem>>, %arg8: memref<96x32xf32, #tpu.memory_space<vmem>>, %arg9: memref<1x32xf32, #tpu.memory_space<vmem>>, %arg10: memref<32x96xf32, #tpu.memory_space<vmem>>, %arg11: memref<1x96xf32, #tpu.memory_space<vmem>>, %arg12: memref<2x16x32xf32, #tpu.memory_space<vmem>>) attributes {dimension_semantics = [#tpu.dimension_semantics<parallel>], iteration_bounds = array<i64: 2>, scalar_prefetch = 0 : i64, scratch_operands = 0 : i64, tpu.core_type = #tpu.core_type<tc>, window_params = [{transform_indices = @transform_0, window_bounds = array<i64: 2, 16, 48>}, {pipeline_mode = #tpu.pipeline_mode<synchronous>, transform_indices = @transform_1, window_bounds = array<i64: 48, 32>}, {pipeline_mode = #tpu.pipeline_mode<synchronous>, transform_indices = @transform_2, window_bounds = array<i64: 1, 32>}, {pipeline_mode = #tpu.pipeline_mode<synchronous>, transform_indices = @transform_3, window_bounds = array<i64: 32, 160>}, {pipeline_mode = #tpu.pipeline_mode<synchronous>, transform_indices = @transform_4, window_bounds = array<i64: 1, 160>}, {pipeline_mode = #tpu.pipeline_mode<synchronous>, transform_indices = @transform_5, window_bounds = array<i64: 64, 32>}, {pipeline_mode = #tpu.pipeline_mode<synchronous>, transform_indices = @transform_6, window_bounds = array<i64: 1, 32>}, {pipeline_mode = #tpu.pipeline_mode<synchronous>, transform_indices = @transform_7, window_bounds = array<i64: 96, 32>}, {pipeline_mode = #tpu.pipeline_mode<synchronous>, transform_indices = @transform_8, window_bounds = array<i64: 1, 32>}, {pipeline_mode = #tpu.pipeline_mode<synchronous>, transform_indices = @transform_9, window_bounds = array<i64: 32, 96>}, {pipeline_mode = #tpu.pipeline_mode<synchronous>, transform_indices = @transform_10, window_bounds = array<i64: 1, 96>}, {transform_indices = @transform_11, window_bounds = array<i64: 2, 16, 32>}]} {
    %c0 = arith.constant 0 : index
    %c0_0 = arith.constant 0 : index
    %c0_1 = arith.constant 0 : index
    %0 = vector.load %arg1[%c0, %c0_0, %c0_1] : memref<2x16x48xf32, #tpu.memory_space<vmem>>, vector<2x16x48xf32>
    %1 = vector.shape_cast %0 : vector<2x16x48xf32> to vector<32x48xf32>
    %c0_2 = arith.constant 0 : index
    %c0_3 = arith.constant 0 : index
    %2 = vector.load %arg2[%c0_2, %c0_3] : memref<48x32xf32, #tpu.memory_space<vmem>>, vector<48x32xf32>
    %cst = arith.constant dense<0.000000e+00> : vector<32x32xf32>
    %3 = tpu.matmul %1, %2, %cst {dimension_numbers = #tpu.dot_dimension_numbers<[1], [0], [0], [1], [0, 0, 1, 1], [], []>} : vector<32x48xf32>, vector<48x32xf32>, vector<32x32xf32> -> vector<32x32xf32>
    %c0_4 = arith.constant 0 : index
    %c0_5 = arith.constant 0 : index
    %4 = vector.load %arg3[%c0_4, %c0_5] : memref<1x32xf32, #tpu.memory_space<vmem>>, vector<1x32xf32>
    %5 = vector.broadcast %4 : vector<1x32xf32> to vector<32x32xf32>
    %6 = arith.addf %3, %5 : vector<32x32xf32>
    %7 = vector.shape_cast %6 : vector<32x32xf32> to vector<2x16x32xf32>
    %c0_6 = arith.constant 0 : index
    %c0_7 = arith.constant 0 : index
    %c0_8 = arith.constant 0 : index
    %8 = vector.load %arg12[%c0_6, %c0_7, %c0_8] : memref<2x16x32xf32, #tpu.memory_space<vmem>>, vector<2x16x32xf32>
    tpu.vector_store %arg12[%c0_6, %c0_7, %c0_8], %7 {strides = array<i32>} : memref<2x16x32xf32, #tpu.memory_space<vmem>>, vector<2x16x32xf32>,
    %c0_9 = arith.constant 0 : index
    %c0_10 = arith.constant 0 : index
    %9 = vector.load %arg4[%c0_9, %c0_10] : memref<32x160xf32, #tpu.memory_space<vmem>>, vector<32x160xf32>
    %cst_11 = arith.constant dense<0.000000e+00> : vector<32x160xf32>
    %10 = tpu.matmul %6, %9, %cst_11 {dimension_numbers = #tpu.dot_dimension_numbers<[1], [0], [0], [1], [0, 0, 1, 1], [], []>} : vector<32x32xf32>, vector<32x160xf32>, vector<32x160xf32> -> vector<32x160xf32>
    %c0_12 = arith.constant 0 : index
    %c0_13 = arith.constant 0 : index
    %11 = vector.load %arg5[%c0_12, %c0_13] : memref<1x160xf32, #tpu.memory_space<vmem>>, vector<1x160xf32>
    %12 = vector.broadcast %11 : vector<1x160xf32> to vector<32x160xf32>
    %13 = arith.addf %10, %12 : vector<32x160xf32>
    %cst_14 = arith.constant 0.000000e+00 : f32
    %14 = vector.broadcast %cst_14 : f32 to vector<32x160xf32>
    %15 = arith.maximumf %13, %14 : vector<32x160xf32>
    %16 = vector.extract_strided_slice %15 {offsets = [0, 0], sizes = [32, 64], strides = [1, 1]} : vector<32x160xf32> to vector<32x64xf32>
    %17 = vector.extract_strided_slice %15 {offsets = [0, 64], sizes = [32, 96], strides = [1, 1]} : vector<32x160xf32> to vector<32x96xf32>
    %c0_15 = arith.constant 0 : index
    %c0_16 = arith.constant 0 : index
    %18 = vector.load %arg6[%c0_15, %c0_16] : memref<64x32xf32, #tpu.memory_space<vmem>>, vector<64x32xf32>
    %cst_17 = arith.constant dense<0.000000e+00> : vector<32x32xf32>
    %19 = tpu.matmul %16, %18, %cst_17 {dimension_numbers = #tpu.dot_dimension_numbers<[1], [0], [0], [1], [0, 0, 1, 1], [], []>} : vector<32x64xf32>, vector<64x32xf32>, vector<32x32xf32> -> vector<32x32xf32>
    %c0_18 = arith.constant 0 : index
    %c0_19 = arith.constant 0 : index
    %20 = vector.load %arg7[%c0_18, %c0_19] : memref<1x32xf32, #tpu.memory_space<vmem>>, vector<1x32xf32>
    %21 = vector.broadcast %20 : vector<1x32xf32> to vector<32x32xf32>
    %22 = arith.addf %19, %21 : vector<32x32xf32>
    %23 = arith.negf %22 : vector<32x32xf32>
    %24 = math.exp %23 : vector<32x32xf32>
    %cst_20 = arith.constant 1.000000e+00 : f32
    %25 = vector.broadcast %cst_20 : f32 to vector<32x32xf32>
    %26 = arith.addf %25, %24 : vector<32x32xf32>
    %27 = arith.divf %25, %26 : vector<32x32xf32>
    %c0_21 = arith.constant 0 : index
    %c0_22 = arith.constant 0 : index
    %28 = vector.load %arg8[%c0_21, %c0_22] : memref<96x32xf32, #tpu.memory_space<vmem>>, vector<96x32xf32>
    %cst_23 = arith.constant dense<0.000000e+00> : vector<32x32xf32>
    %29 = tpu.matmul %17, %28, %cst_23 {dimension_numbers = #tpu.dot_dimension_numbers<[1], [0], [0], [1], [0, 0, 1, 1], [], []>} : vector<32x96xf32>, vector<96x32xf32>, vector<32x32xf32> -> vector<32x32xf32>
    %c0_24 = arith.constant 0 : index
    %c0_25 = arith.constant 0 : index
    %30 = vector.load %arg9[%c0_24, %c0_25] : memref<1x32xf32, #tpu.memory_space<vmem>>, vector<1x32xf32>
    %31 = vector.broadcast %30 : vector<1x32xf32> to vector<32x32xf32>
    %32 = arith.addf %29, %31 : vector<32x32xf32>
    %33 = arith.negf %32 : vector<32x32xf32>
    %34 = math.exp %33 : vector<32x32xf32>
    %cst_26 = arith.constant 1.000000e+00 : f32
    %35 = vector.broadcast %cst_26 : f32 to vector<32x32xf32>
    %36 = arith.addf %35, %34 : vector<32x32xf32>
    %37 = arith.divf %35, %36 : vector<32x32xf32>
    %c0_27 = arith.constant 0 : index
    %c0_28 = arith.constant 0 : index
    %38 = vector.load %arg10[%c0_27, %c0_28] : memref<32x96xf32, #tpu.memory_space<vmem>>, vector<32x96xf32>
    %c0_29 = arith.constant 0 : index
    %c0_30 = arith.constant 0 : index
    %39 = vector.load %arg11[%c0_29, %c0_30] : memref<1x96xf32, #tpu.memory_space<vmem>>, vector<1x96xf32>
    %cst_31 = arith.constant dense<0.000000e+00> : vector<32x96xf32>
    %40 = tpu.matmul %27, %38, %cst_31 {dimension_numbers = #tpu.dot_dimension_numbers<[1], [0], [0], [1], [0, 0, 1, 1], [], []>} : vector<32x32xf32>, vector<32x96xf32>, vector<32x96xf32> -> vector<32x96xf32>
    %41 = vector.broadcast %39 : vector<1x96xf32> to vector<32x96xf32>
    %42 = arith.addf %40, %41 : vector<32x96xf32>
    %cst_32 = arith.constant dense<0.000000e+00> : vector<32x96xf32>
    %43 = tpu.matmul %37, %38, %cst_32 {dimension_numbers = #tpu.dot_dimension_numbers<[1], [0], [0], [1], [0, 0, 1, 1], [], []>} : vector<32x32xf32>, vector<32x96xf32>, vector<32x96xf32> -> vector<32x96xf32>
    %44 = vector.broadcast %39 : vector<1x96xf32> to vector<32x96xf32>
    %45 = arith.addf %43, %44 : vector<32x96xf32>
    %46 = vector.extract_strided_slice %42 {offsets = [0, 0], sizes = [32, 32], strides = [1, 1]} : vector<32x96xf32> to vector<32x32xf32>
    %47 = vector.extract_strided_slice %42 {offsets = [0, 32], sizes = [32, 32], strides = [1, 1]} : vector<32x96xf32> to vector<32x32xf32>
    %48 = vector.extract_strided_slice %42 {offsets = [0, 64], sizes = [32, 32], strides = [1, 1]} : vector<32x96xf32> to vector<32x32xf32>
    %49 = vector.extract_strided_slice %45 {offsets = [0, 0], sizes = [32, 32], strides = [1, 1]} : vector<32x96xf32> to vector<32x32xf32>
    %50 = vector.extract_strided_slice %45 {offsets = [0, 32], sizes = [32, 32], strides = [1, 1]} : vector<32x96xf32> to vector<32x32xf32>
    %51 = vector.extract_strided_slice %45 {offsets = [0, 64], sizes = [32, 32], strides = [1, 1]} : vector<32x96xf32> to vector<32x32xf32>
    %52 = vector.shape_cast %46 : vector<32x32xf32> to vector<2x16x32xf32>
    %53 = vector.shape_cast %50 : vector<32x32xf32> to vector<2x16x32xf32>
    %54 = vector.shape_cast %51 : vector<32x32xf32> to vector<2x16x32xf32>
    "tpu.trace_start"() <{level = 10 : i32, message = "bqd,bkd->bqk"}> : () -> ()
    %cst_33 = arith.constant dense<0.000000e+00> : vector<2x16x16xf32>
    %55 = tpu.matmul %52, %53, %cst_33 {dimension_numbers = #tpu.dot_dimension_numbers<[2], [2], [1], [1], [0, 0, 0, 1, 1, 1], [0], [0]>} : vector<2x16x32xf32>, vector<2x16x32xf32>, vector<2x16x16xf32> -> vector<2x16x16xf32>
    "tpu.trace_stop"() : () -> ()
    %cst_34 = arith.constant dense<0xFF800000> : vector<2x16xf32>
    %56 = vector.multi_reduction <maximumf>, %55, %cst_34 [2] : vector<2x16x16xf32> to vector<2x16xf32>
    %57 = vector.shape_cast %56 : vector<2x16xf32> to vector<2x16x1xf32>
    %58 = vector.broadcast %57 : vector<2x16x1xf32> to vector<2x16x16xf32>
    %59 = arith.subf %55, %58 : vector<2x16x16xf32>
    %60 = math.exp %59 : vector<2x16x16xf32>
    %cst_35 = arith.constant dense<0.000000e+00> : vector<2x16xf32>
    %61 = vector.multi_reduction <add>, %60, %cst_35 [2] : vector<2x16x16xf32> to vector<2x16xf32>
    %62 = vector.shape_cast %61 : vector<2x16xf32> to vector<2x16x1xf32>
    %63 = vector.broadcast %62 : vector<2x16x1xf32> to vector<2x16x16xf32>
    %64 = arith.divf %60, %63 : vector<2x16x16xf32>
    "tpu.trace_start"() <{level = 10 : i32, message = "bqk,bkd->bqd"}> : () -> ()
    %cst_36 = arith.constant dense<0.000000e+00> : vector<2x16x32xf32>
    %65 = tpu.matmul %64, %54, %cst_36 {dimension_numbers = #tpu.dot_dimension_numbers<[2], [1], [1], [2], [0, 0, 0, 1, 1, 2], [0], [0]>} : vector<2x16x16xf32>, vector<2x16x32xf32>, vector<2x16x32xf32> -> vector<2x16x32xf32>
    "tpu.trace_stop"() : () -> ()
    %66 = vector.shape_cast %49 : vector<32x32xf32> to vector<2x16x32xf32>
    %67 = vector.shape_cast %47 : vector<32x32xf32> to vector<2x16x32xf32>
    %68 = vector.shape_cast %48 : vector<32x32xf32> to vector<2x16x32xf32>
    "tpu.trace_start"() <{level = 10 : i32, message = "bqd,bkd->bqk"}> : () -> ()
    %cst_37 = arith.constant dense<0.000000e+00> : vector<2x16x16xf32>
    %69 = tpu.matmul %66, %67, %cst_37 {dimension_numbers = #tpu.dot_dimension_numbers<[2], [2], [1], [1], [0, 0, 0, 1, 1, 1], [0], [0]>} : vector<2x16x32xf32>, vector<2x16x32xf32>, vector<2x16x16xf32> -> vector<2x16x16xf32>
    "tpu.trace_stop"() : () -> ()
    %cst_38 = arith.constant dense<0xFF800000> : vector<2x16xf32>
    %70 = vector.multi_reduction <maximumf>, %69, %cst_38 [2] : vector<2x16x16xf32> to vector<2x16xf32>
    %71 = vector.shape_cast %70 : vector<2x16xf32> to vector<2x16x1xf32>
    %72 = vector.broadcast %71 : vector<2x16x1xf32> to vector<2x16x16xf32>
    %73 = arith.subf %69, %72 : vector<2x16x16xf32>
    %74 = math.exp %73 : vector<2x16x16xf32>
    %cst_39 = arith.constant dense<0.000000e+00> : vector<2x16xf32>
    %75 = vector.multi_reduction <add>, %74, %cst_39 [2] : vector<2x16x16xf32> to vector<2x16xf32>
    %76 = vector.shape_cast %75 : vector<2x16xf32> to vector<2x16x1xf32>
    %77 = vector.broadcast %76 : vector<2x16x1xf32> to vector<2x16x16xf32>
    %78 = arith.divf %74, %77 : vector<2x16x16xf32>
    "tpu.trace_start"() <{level = 10 : i32, message = "bqk,bkd->bqd"}> : () -> ()
    %cst_40 = arith.constant dense<0.000000e+00> : vector<2x16x32xf32>
    %79 = tpu.matmul %78, %68, %cst_40 {dimension_numbers = #tpu.dot_dimension_numbers<[2], [1], [1], [2], [0, 0, 0, 1, 1, 2], [0], [0]>} : vector<2x16x16xf32>, vector<2x16x32xf32>, vector<2x16x32xf32> -> vector<2x16x32xf32>
    "tpu.trace_stop"() : () -> ()
    %80 = arith.addf %65, %79 : vector<2x16x32xf32>
    %cst_41 = arith.constant 3.000000e-01 : f32
    %81 = vector.broadcast %cst_41 : f32 to vector<2x16x32xf32>
    %82 = arith.mulf %81, %80 : vector<2x16x32xf32>
    %c0_42 = arith.constant 0 : index
    %c0_43 = arith.constant 0 : index
    %c0_44 = arith.constant 0 : index
    %83 = vector.load %arg12[%c0_42, %c0_43, %c0_44] : memref<2x16x32xf32, #tpu.memory_space<vmem>>, vector<2x16x32xf32>
    %84 = arith.addf %83, %82 : vector<2x16x32xf32>
    %c0_45 = arith.constant 0 : index
    %c0_46 = arith.constant 0 : index
    %c0_47 = arith.constant 0 : index
    %85 = vector.load %arg12[%c0_45, %c0_46, %c0_47] : memref<2x16x32xf32, #tpu.memory_space<vmem>>, vector<2x16x32xf32>
    tpu.vector_store %arg12[%c0_45, %c0_46, %c0_47], %84 {strides = array<i32>} : memref<2x16x32xf32, #tpu.memory_space<vmem>>, vector<2x16x32xf32>,
    return
  }
  func.func @transform_0(%arg0: i32) -> (i32, i32, i32) {
    %c0_i32 = arith.constant 0 : i32
    %c0_i32_0 = arith.constant 0 : i32
    %c0_i32_1 = arith.constant 0 : i32
    return %arg0, %c0_i32, %c0_i32_0 : i32, i32, i32
  }
  func.func @transform_1(%arg0: i32) -> (i32, i32) {
    %c0_i32 = arith.constant 0 : i32
    %c0_i32_0 = arith.constant 0 : i32
    %c0_i32_1 = arith.constant 0 : i32
    return %c0_i32, %c0_i32_0 : i32, i32
  }
  func.func @transform_2(%arg0: i32) -> (i32, i32) {
    %c0_i32 = arith.constant 0 : i32
    %c0_i32_0 = arith.constant 0 : i32
    %c0_i32_1 = arith.constant 0 : i32
    return %c0_i32, %c0_i32_0 : i32, i32
  }
  func.func @transform_3(%arg0: i32) -> (i32, i32) {
    %c0_i32 = arith.constant 0 : i32
    %c0_i32_0 = arith.constant 0 : i32
    %c0_i32_1 = arith.constant 0 : i32
    return %c0_i32, %c0_i32_0 : i32, i32
  }
  func.func @transform_4(%arg0: i32) -> (i32, i32) {
    %c0_i32 = arith.constant 0 : i32
    %c0_i32_0 = arith.constant 0 : i32
    %c0_i32_1 = arith.constant 0 : i32
    return %c0_i32, %c0_i32_0 : i32, i32
  }
  func.func @transform_5(%arg0: i32) -> (i32, i32) {
    %c0_i32 = arith.constant 0 : i32
    %c0_i32_0 = arith.constant 0 : i32
    %c0_i32_1 = arith.constant 0 : i32
    return %c0_i32, %c0_i32_0 : i32, i32
  }
  func.func @transform_6(%arg0: i32) -> (i32, i32) {
    %c0_i32 = arith.constant 0 : i32
    %c0_i32_0 = arith.constant 0 : i32
    %c0_i32_1 = arith.constant 0 : i32
    return %c0_i32, %c0_i32_0 : i32, i32
  }
  func.func @transform_7(%arg0: i32) -> (i32, i32) {
    %c0_i32 = arith.constant 0 : i32
    %c0_i32_0 = arith.constant 0 : i32
    %c0_i32_1 = arith.constant 0 : i32
    return %c0_i32, %c0_i32_0 : i32, i32
  }
  func.func @transform_8(%arg0: i32) -> (i32, i32) {
    %c0_i32 = arith.constant 0 : i32
    %c0_i32_0 = arith.constant 0 : i32
    %c0_i32_1 = arith.constant 0 : i32
    return %c0_i32, %c0_i32_0 : i32, i32
  }
  func.func @transform_9(%arg0: i32) -> (i32, i32) {
    %c0_i32 = arith.constant 0 : i32
    %c0_i32_0 = arith.constant 0 : i32
    %c0_i32_1 = arith.constant 0 : i32
    return %c0_i32, %c0_i32_0 : i32, i32
  }
  func.func @transform_10(%arg0: i32) -> (i32, i32) {
    %c0_i32 = arith.constant 0 : i32
    %c0_i32_0 = arith.constant 0 : i32
    %c0_i32_1 = arith.constant 0 : i32
    return %c0_i32, %c0_i32_0 : i32, i32
  }
  func.func @transform_11(%arg0: i32) -> (i32, i32, i32) {
    %c0_i32 = arith.constant 0 : i32
    %c0_i32_0 = arith.constant 0 : i32
    %c0_i32_1 = arith.constant 0 : i32
    return %arg0, %c0_i32, %c0_i32_0 : i32, i32, i32
  }
}

module attributes {stable_mosaic.version = 11 : i64} {
  func.func @vision_trans_encoder_kernel(%arg0: i32, %arg1: memref<2x16x48xf32, #tpu.memory_space<vmem>>, %arg2: memref<48x32xf32, #tpu.memory_space<vmem>>, %arg3: memref<1x32xf32, #tpu.memory_space<vmem>>, %arg4: memref<32x160xf32, #tpu.memory_space<vmem>>, %arg5: memref<1x160xf32, #tpu.memory_space<vmem>>, %arg6: memref<64x32xf32, #tpu.memory_space<vmem>>, %arg7: memref<1x32xf32, #tpu.memory_space<vmem>>, %arg8: memref<96x32xf32, #tpu.memory_space<vmem>>, %arg9: memref<1x32xf32, #tpu.memory_space<vmem>>, %arg10: memref<32x96xf32, #tpu.memory_space<vmem>>, %arg11: memref<1x96xf32, #tpu.memory_space<vmem>>, %arg12: memref<2x16x32xf32, #tpu.memory_space<vmem>>) attributes {dimension_semantics = [#tpu.dimension_semantics<parallel>], iteration_bounds = array<i64: 2>, scalar_prefetch = 0 : i64, scratch_operands = 0 : i64, tpu.core_type = #tpu.core_type<tc>, window_params = [{transform_indices = @transform_0, window_bounds = array<i64: 2, 16, 48>}, {pipeline_mode = #tpu.pipeline_mode<synchronous>, transform_indices = @transform_1, window_bounds = array<i64: 48, 32>}, {pipeline_mode = #tpu.pipeline_mode<synchronous>, transform_indices = @transform_2, window_bounds = array<i64: 1, 32>}, {pipeline_mode = #tpu.pipeline_mode<synchronous>, transform_indices = @transform_3, window_bounds = array<i64: 32, 160>}, {pipeline_mode = #tpu.pipeline_mode<synchronous>, transform_indices = @transform_4, window_bounds = array<i64: 1, 160>}, {pipeline_mode = #tpu.pipeline_mode<synchronous>, transform_indices = @transform_5, window_bounds = array<i64: 64, 32>}, {pipeline_mode = #tpu.pipeline_mode<synchronous>, transform_indices = @transform_6, window_bounds = array<i64: 1, 32>}, {pipeline_mode = #tpu.pipeline_mode<synchronous>, transform_indices = @transform_7, window_bounds = array<i64: 96, 32>}, {pipeline_mode = #tpu.pipeline_mode<synchronous>, transform_indices = @transform_8, window_bounds = array<i64: 1, 32>}, {pipeline_mode = #tpu.pipeline_mode<synchronous>, transform_indices = @transform_9, window_bounds = array<i64: 32, 96>}, {pipeline_mode = #tpu.pipeline_mode<synchronous>, transform_indices = @transform_10, window_bounds = array<i64: 1, 96>}, {transform_indices = @transform_11, window_bounds = array<i64: 2, 16, 32>}]} {
    %c0 = arith.constant 0 : index
    %c0_0 = arith.constant 0 : index
    %c0_1 = arith.constant 0 : index
    %0 = vector.load %arg1[%c0, %c0_0, %c0_1] : memref<2x16x48xf32, #tpu.memory_space<vmem>>, vector<2x16x48xf32>
    %1 = vector.shape_cast %0 : vector<2x16x48xf32> to vector<32x48xf32>
    %c0_2 = arith.constant 0 : index
    %c0_3 = arith.constant 0 : index
    %2 = vector.load %arg2[%c0_2, %c0_3] : memref<48x32xf32, #tpu.memory_space<vmem>>, vector<48x32xf32>
    %cst = arith.constant dense<0.000000e+00> : vector<32x32xf32>
    %3 = tpu.matmul %1, %2, %cst {dimension_numbers = #tpu.dot_dimension_numbers<[1], [0], [0], [1], [0, 0, 1, 1], [], []>} : vector<32x48xf32>, vector<48x32xf32>, vector<32x32xf32> -> vector<32x32xf32>
    %c0_4 = arith.constant 0 : index
    %c0_5 = arith.constant 0 : index
    %4 = vector.load %arg3[%c0_4, %c0_5] : memref<1x32xf32, #tpu.memory_space<vmem>>, vector<1x32xf32>
    %5 = vector.broadcast %4 : vector<1x32xf32> to vector<32x32xf32>
    %6 = arith.addf %3, %5 : vector<32x32xf32>
    %7 = vector.shape_cast %6 : vector<32x32xf32> to vector<2x16x32xf32>
    %c0_6 = arith.constant 0 : index
    %c0_7 = arith.constant 0 : index
    %c0_8 = arith.constant 0 : index
    %8 = vector.load %arg12[%c0_6, %c0_7, %c0_8] : memref<2x16x32xf32, #tpu.memory_space<vmem>>, vector<2x16x32xf32>
    tpu.vector_store %arg12[%c0_6, %c0_7, %c0_8], %7 {strides = array<i32>} : memref<2x16x32xf32, #tpu.memory_space<vmem>>, vector<2x16x32xf32>,
    %c0_9 = arith.constant 0 : index
    %c0_10 = arith.constant 0 : index
    %9 = vector.load %arg4[%c0_9, %c0_10] : memref<32x160xf32, #tpu.memory_space<vmem>>, vector<32x160xf32>
    %cst_11 = arith.constant dense<0.000000e+00> : vector<32x160xf32>
    %10 = tpu.matmul %6, %9, %cst_11 {dimension_numbers = #tpu.dot_dimension_numbers<[1], [0], [0], [1], [0, 0, 1, 1], [], []>} : vector<32x32xf32>, vector<32x160xf32>, vector<32x160xf32> -> vector<32x160xf32>
    %c0_12 = arith.constant 0 : index
    %c0_13 = arith.constant 0 : index
    %11 = vector.load %arg5[%c0_12, %c0_13] : memref<1x160xf32, #tpu.memory_space<vmem>>, vector<1x160xf32>
    %12 = vector.broadcast %11 : vector<1x160xf32> to vector<32x160xf32>
    %13 = arith.addf %10, %12 : vector<32x160xf32>
    %cst_14 = arith.constant 0.000000e+00 : f32
    %14 = vector.broadcast %cst_14 : f32 to vector<32x160xf32>
    %15 = arith.maximumf %13, %14 : vector<32x160xf32>
    %16 = vector.extract_strided_slice %15 {offsets = [0, 0], sizes = [32, 64], strides = [1, 1]} : vector<32x160xf32> to vector<32x64xf32>
    %17 = vector.extract_strided_slice %15 {offsets = [0, 64], sizes = [32, 96], strides = [1, 1]} : vector<32x160xf32> to vector<32x96xf32>
    %c0_15 = arith.constant 0 : index
    %c0_16 = arith.constant 0 : index
    %18 = vector.load %arg6[%c0_15, %c0_16] : memref<64x32xf32, #tpu.memory_space<vmem>>, vector<64x32xf32>
    %cst_17 = arith.constant dense<0.000000e+00> : vector<32x32xf32>
    %19 = tpu.matmul %16, %18, %cst_17 {dimension_numbers = #tpu.dot_dimension_numbers<[1], [0], [0], [1], [0, 0, 1, 1], [], []>} : vector<32x64xf32>, vector<64x32xf32>, vector<32x32xf32> -> vector<32x32xf32>
    %c0_18 = arith.constant 0 : index
    %c0_19 = arith.constant 0 : index
    %20 = vector.load %arg7[%c0_18, %c0_19] : memref<1x32xf32, #tpu.memory_space<vmem>>, vector<1x32xf32>
    %21 = vector.broadcast %20 : vector<1x32xf32> to vector<32x32xf32>
    %22 = arith.addf %19, %21 : vector<32x32xf32>
    %23 = arith.negf %22 : vector<32x32xf32>
    %24 = math.exp %23 : vector<32x32xf32>
    %cst_20 = arith.constant 1.000000e+00 : f32
    %25 = vector.broadcast %cst_20 : f32 to vector<32x32xf32>
    %26 = arith.addf %25, %24 : vector<32x32xf32>
    %27 = arith.divf %25, %26 : vector<32x32xf32>
    %c0_21 = arith.constant 0 : index
    %c0_22 = arith.constant 0 : index
    %28 = vector.load %arg8[%c0_21, %c0_22] : memref<96x32xf32, #tpu.memory_space<vmem>>, vector<96x32xf32>
    %cst_23 = arith.constant dense<0.000000e+00> : vector<32x32xf32>
    %29 = tpu.matmul %17, %28, %cst_23 {dimension_numbers = #tpu.dot_dimension_numbers<[1], [0], [0], [1], [0, 0, 1, 1], [], []>} : vector<32x96xf32>, vector<96x32xf32>, vector<32x32xf32> -> vector<32x32xf32>
    %c0_24 = arith.constant 0 : index
    %c0_25 = arith.constant 0 : index
    %30 = vector.load %arg9[%c0_24, %c0_25] : memref<1x32xf32, #tpu.memory_space<vmem>>, vector<1x32xf32>
    %31 = vector.broadcast %30 : vector<1x32xf32> to vector<32x32xf32>
    %32 = arith.addf %29, %31 : vector<32x32xf32>
    %33 = arith.negf %32 : vector<32x32xf32>
    %34 = math.exp %33 : vector<32x32xf32>
    %cst_26 = arith.constant 1.000000e+00 : f32
    %35 = vector.broadcast %cst_26 : f32 to vector<32x32xf32>
    %36 = arith.addf %35, %34 : vector<32x32xf32>
    %37 = arith.divf %35, %36 : vector<32x32xf32>
    %c0_27 = arith.constant 0 : index
    %c0_28 = arith.constant 0 : index
    %38 = vector.load %arg10[%c0_27, %c0_28] : memref<32x96xf32, #tpu.memory_space<vmem>>, vector<32x96xf32>
    %c0_29 = arith.constant 0 : index
    %c0_30 = arith.constant 0 : index
    %39 = vector.load %arg11[%c0_29, %c0_30] : memref<1x96xf32, #tpu.memory_space<vmem>>, vector<1x96xf32>
    %cst_31 = arith.constant dense<0.000000e+00> : vector<32x96xf32>
    %40 = tpu.matmul %27, %38, %cst_31 {dimension_numbers = #tpu.dot_dimension_numbers<[1], [0], [0], [1], [0, 0, 1, 1], [], []>} : vector<32x32xf32>, vector<32x96xf32>, vector<32x96xf32> -> vector<32x96xf32>
    %41 = vector.broadcast %39 : vector<1x96xf32> to vector<32x96xf32>
    %42 = arith.addf %40, %41 : vector<32x96xf32>
    %cst_32 = arith.constant dense<0.000000e+00> : vector<32x96xf32>
    %43 = tpu.matmul %37, %38, %cst_32 {dimension_numbers = #tpu.dot_dimension_numbers<[1], [0], [0], [1], [0, 0, 1, 1], [], []>} : vector<32x32xf32>, vector<32x96xf32>, vector<32x96xf32> -> vector<32x96xf32>
    %44 = vector.broadcast %39 : vector<1x96xf32> to vector<32x96xf32>
    %45 = arith.addf %43, %44 : vector<32x96xf32>
    %46 = vector.extract_strided_slice %42 {offsets = [0, 0], sizes = [32, 32], strides = [1, 1]} : vector<32x96xf32> to vector<32x32xf32>
    %47 = vector.extract_strided_slice %42 {offsets = [0, 32], sizes = [32, 32], strides = [1, 1]} : vector<32x96xf32> to vector<32x32xf32>
    %48 = vector.extract_strided_slice %42 {offsets = [0, 64], sizes = [32, 32], strides = [1, 1]} : vector<32x96xf32> to vector<32x32xf32>
    %49 = vector.extract_strided_slice %45 {offsets = [0, 0], sizes = [32, 32], strides = [1, 1]} : vector<32x96xf32> to vector<32x32xf32>
    %50 = vector.extract_strided_slice %45 {offsets = [0, 32], sizes = [32, 32], strides = [1, 1]} : vector<32x96xf32> to vector<32x32xf32>
    %51 = vector.extract_strided_slice %45 {offsets = [0, 64], sizes = [32, 32], strides = [1, 1]} : vector<32x96xf32> to vector<32x32xf32>
    %52 = vector.shape_cast %46 : vector<32x32xf32> to vector<2x16x32xf32>
    %53 = vector.shape_cast %50 : vector<32x32xf32> to vector<2x16x32xf32>
    %54 = vector.shape_cast %51 : vector<32x32xf32> to vector<2x16x32xf32>
    "tpu.trace_start"() <{level = 10 : i32, message = "bqd,bkd->bqk"}> : () -> ()
    %cst_33 = arith.constant dense<0.000000e+00> : vector<2x16x16xf32>
    %55 = tpu.matmul %52, %53, %cst_33 {dimension_numbers = #tpu.dot_dimension_numbers<[2], [2], [1], [1], [0, 0, 0, 1, 1, 1], [0], [0]>} : vector<2x16x32xf32>, vector<2x16x32xf32>, vector<2x16x16xf32> -> vector<2x16x16xf32>
    "tpu.trace_stop"() : () -> ()
    %cst_34 = arith.constant dense<0xFF800000> : vector<2x16xf32>
    %56 = vector.multi_reduction <maximumf>, %55, %cst_34 [2] : vector<2x16x16xf32> to vector<2x16xf32>
    %57 = vector.shape_cast %56 : vector<2x16xf32> to vector<2x16x1xf32>
    %58 = vector.broadcast %57 : vector<2x16x1xf32> to vector<2x16x16xf32>
    %59 = arith.subf %55, %58 : vector<2x16x16xf32>
    %60 = math.exp %59 : vector<2x16x16xf32>
    %cst_35 = arith.constant dense<0.000000e+00> : vector<2x16xf32>
    %61 = vector.multi_reduction <add>, %60, %cst_35 [2] : vector<2x16x16xf32> to vector<2x16xf32>
    %62 = vector.shape_cast %61 : vector<2x16xf32> to vector<2x16x1xf32>
    %63 = vector.broadcast %62 : vector<2x16x1xf32> to vector<2x16x16xf32>
    %64 = arith.divf %60, %63 : vector<2x16x16xf32>
    "tpu.trace_start"() <{level = 10 : i32, message = "bqk,bkd->bqd"}> : () -> ()
    %cst_36 = arith.constant dense<0.000000e+00> : vector<2x16x32xf32>
    %65 = tpu.matmul %64, %54, %cst_36 {dimension_numbers = #tpu.dot_dimension_numbers<[2], [1], [1], [2], [0, 0, 0, 1, 1, 2], [0], [0]>} : vector<2x16x16xf32>, vector<2x16x32xf32>, vector<2x16x32xf32> -> vector<2x16x32xf32>
    "tpu.trace_stop"() : () -> ()
    %66 = vector.shape_cast %49 : vector<32x32xf32> to vector<2x16x32xf32>
    %67 = vector.shape_cast %47 : vector<32x32xf32> to vector<2x16x32xf32>
    %68 = vector.shape_cast %48 : vector<32x32xf32> to vector<2x16x32xf32>
    "tpu.trace_start"() <{level = 10 : i32, message = "bqd,bkd->bqk"}> : () -> ()
    %cst_37 = arith.constant dense<0.000000e+00> : vector<2x16x16xf32>
    %69 = tpu.matmul %66, %67, %cst_37 {dimension_numbers = #tpu.dot_dimension_numbers<[2], [2], [1], [1], [0, 0, 0, 1, 1, 1], [0], [0]>} : vector<2x16x32xf32>, vector<2x16x32xf32>, vector<2x16x16xf32> -> vector<2x16x16xf32>
    "tpu.trace_stop"() : () -> ()
    %cst_38 = arith.constant dense<0xFF800000> : vector<2x16xf32>
    %70 = vector.multi_reduction <maximumf>, %69, %cst_38 [2] : vector<2x16x16xf32> to vector<2x16xf32>
    %71 = vector.shape_cast %70 : vector<2x16xf32> to vector<2x16x1xf32>
    %72 = vector.broadcast %71 : vector<2x16x1xf32> to vector<2x16x16xf32>
    %73 = arith.subf %69, %72 : vector<2x16x16xf32>
    %74 = math.exp %73 : vector<2x16x16xf32>
    %cst_39 = arith.constant dense<0.000000e+00> : vector<2x16xf32>
    %75 = vector.multi_reduction <add>, %74, %cst_39 [2] : vector<2x16x16xf32> to vector<2x16xf32>
    %76 = vector.shape_cast %75 : vector<2x16xf32> to vector<2x16x1xf32>
    %77 = vector.broadcast %76 : vector<2x16x1xf32> to vector<2x16x16xf32>
    %78 = arith.divf %74, %77 : vector<2x16x16xf32>
    "tpu.trace_start"() <{level = 10 : i32, message = "bqk,bkd->bqd"}> : () -> ()
    %cst_40 = arith.constant dense<0.000000e+00> : vector<2x16x32xf32>
    %79 = tpu.matmul %78, %68, %cst_40 {dimension_numbers = #tpu.dot_dimension_numbers<[2], [1], [1], [2], [0, 0, 0, 1, 1, 2], [0], [0]>} : vector<2x16x16xf32>, vector<2x16x32xf32>, vector<2x16x32xf32> -> vector<2x16x32xf32>
    "tpu.trace_stop"() : () -> ()
    %80 = arith.addf %65, %79 : vector<2x16x32xf32>
    %cst_41 = arith.constant 3.000000e-01 : f32
    %81 = vector.broadcast %cst_41 : f32 to vector<2x16x32xf32>
    %82 = arith.mulf %81, %80 : vector<2x16x32xf32>
    %c0_42 = arith.constant 0 : index
    %c0_43 = arith.constant 0 : index
    %c0_44 = arith.constant 0 : index
    %83 = vector.load %arg12[%c0_42, %c0_43, %c0_44] : memref<2x16x32xf32, #tpu.memory_space<vmem>>, vector<2x16x32xf32>
    %84 = arith.addf %83, %82 : vector<2x16x32xf32>
    %c0_45 = arith.constant 0 : index
    %c0_46 = arith.constant 0 : index
    %c0_47 = arith.constant 0 : index
    %85 = vector.load %arg12[%c0_45, %c0_46, %c0_47] : memref<2x16x32xf32, #tpu.memory_space<vmem>>, vector<2x16x32xf32>
    tpu.vector_store %arg12[%c0_45, %c0_46, %c0_47], %84 {strides = array<i32>} : memref<2x16x32xf32, #tpu.memory_space<vmem>>, vector<2x16x32xf32>,
    return
  }
  func.func @transform_0(%arg0: i32) -> (i32, i32, i32) {
    %c0_i32 = arith.constant 0 : i32
    %c0_i32_0 = arith.constant 0 : i32
    %c0_i32_1 = arith.constant 0 : i32
    return %arg0, %c0_i32, %c0_i32_0 : i32, i32, i32
  }
  func.func @transform_1(%arg0: i32) -> (i32, i32) {
    %c0_i32 = arith.constant 0 : i32
    %c0_i32_0 = arith.constant 0 : i32
    %c0_i32_1 = arith.constant 0 : i32
    return %c0_i32, %c0_i32_0 : i32, i32
  }
  func.func @transform_2(%arg0: i32) -> (i32, i32) {
    %c0_i32 = arith.constant 0 : i32
    %c0_i32_0 = arith.constant 0 : i32
    %c0_i32_1 = arith.constant 0 : i32
    return %c0_i32, %c0_i32_0 : i32, i32
  }
  func.func @transform_3(%arg0: i32) -> (i32, i32) {
    %c0_i32 = arith.constant 0 : i32
    %c0_i32_0 = arith.constant 0 : i32
    %c0_i32_1 = arith.constant 0 : i32
    return %c0_i32, %c0_i32_0 : i32, i32
  }
  func.func @transform_4(%arg0: i32) -> (i32, i32) {
    %c0_i32 = arith.constant 0 : i32
    %c0_i32_0 = arith.constant 0 : i32
    %c0_i32_1 = arith.constant 0 : i32
    return %c0_i32, %c0_i32_0 : i32, i32
  }
  func.func @transform_5(%arg0: i32) -> (i32, i32) {
    %c0_i32 = arith.constant 0 : i32
    %c0_i32_0 = arith.constant 0 : i32
    %c0_i32_1 = arith.constant 0 : i32
    return %c0_i32, %c0_i32_0 : i32, i32
  }
  func.func @transform_6(%arg0: i32) -> (i32, i32) {
    %c0_i32 = arith.constant 0 : i32
    %c0_i32_0 = arith.constant 0 : i32
    %c0_i32_1 = arith.constant 0 : i32
    return %c0_i32, %c0_i32_0 : i32, i32
  }
  func.func @transform_7(%arg0: i32) -> (i32, i32) {
    %c0_i32 = arith.constant 0 : i32
    %c0_i32_0 = arith.constant 0 : i32
    %c0_i32_1 = arith.constant 0 : i32
    return %c0_i32, %c0_i32_0 : i32, i32
  }
  func.func @transform_8(%arg0: i32) -> (i32, i32) {
    %c0_i32 = arith.constant 0 : i32
    %c0_i32_0 = arith.constant 0 : i32
    %c0_i32_1 = arith.constant 0 : i32
    return %c0_i32, %c0_i32_0 : i32, i32
  }
  func.func @transform_9(%arg0: i32) -> (i32, i32) {
    %c0_i32 = arith.constant 0 : i32
    %c0_i32_0 = arith.constant 0 : i32
    %c0_i32_1 = arith.constant 0 : i32
    return %c0_i32, %c0_i32_0 : i32, i32
  }
  func.func @transform_10(%arg0: i32) -> (i32, i32) {
    %c0_i32 = arith.constant 0 : i32
    %c0_i32_0 = arith.constant 0 : i32
    %c0_i32_1 = arith.constant 0 : i32
    return %c0_i32, %c0_i32_0 : i32, i32
  }
  func.func @transform_11(%arg0: i32) -> (i32, i32, i32) {
    %c0_i32 = arith.constant 0 : i32
    %c0_i32_0 = arith.constant 0 : i32
    %c0_i32_1 = arith.constant 0 : i32
    return %arg0, %c0_i32, %c0_i32_0 : i32, i32, i32
  }
}

</mosaic_0001>

<bundles_post_ra>
// kernel: tpu_custom_call.1
= control target key start
LH: loop header
LB: loop body
LE: loop exit
PB: predicated region body
PF: predicated region fallthrough
CT: control target
= control target key end

     0   :  { %16 = vsyncpa [#allocation3], 0  ;;  %s3132_s0 = inlined_call_operand.vmem [shape: f32[4,16,48], index: 0, kind: input, shape index: {}]   ;;  %s3133_s1 = inlined_call_operand.vmem [shape: f32[48,32], index: 1, kind: input, shape index: {}]   ;;  %s3134_s2 = inlined_call_operand.vmem [shape: f32[1,32], index: 2, kind: input, shape index: {}]   ;;  %s3135_s3 = inlined_call_operand.vmem [shape: f32[32,160], index: 3, kind: input, shape index: {}]   ;;  %s3136_s4 = inlined_call_operand.vmem [shape: f32[1,160], index: 4, kind: input, shape index: {}]   ;;  %s3137_s5 = inlined_call_operand.vmem [shape: f32[64,32], index: 5, kind: input, shape index: {}]   ;;  %s3138_s6 = inlined_call_operand.vmem [shape: f32[1,32], index: 6, kind: input, shape index: {}]   ;;  %s3139_s7 = inlined_call_operand.vmem [shape: f32[96,32], index: 7, kind: input, shape index: {}]   ;;  %s3140_s8 = inlined_call_operand.vmem [shape: f32[1,32], index: 8, kind: input, shape index: {}]   ;;  %s3141_s9 = inlined_call_operand.vmem [shape: f32[32,96], index: 9, kind: input, shape index: {}]   ;;  %s3142_s10 = inlined_call_operand.vmem [shape: f32[1,96], index: 10, kind: input, shape index: {}]   ;;  %s3143_s11 = inlined_call_operand.hbm [shape: f32[4,16,32], index: 11, kind: output, shape index: {}]  }
   0x1   :  { %18 = vsyncpa [#allocation3 + $0x1], 0  ;;  %s2744_s17 = smov 0   ;;  %s2746_s18 = smov 0  }
   0x2   :  { %s2748_s19 = smov 0   ;;  %s2750_s20 = smov 0  }
   0x3 LB: > { %s2765_s21 = sadd.s32 4294967295, %s2676_s20   ;;  %s2029_s22 = sadd.s32 4294967294, %s2676_s20   ;;  %s2676_s20 = sphi %s2750_s20, %s3155_s20   ;;  %s2672_s19 = sphi %s2748_s19, %s3154_s19   ;;  %s2668_s18 = sphi %s2746_s18, %s3153_s18   ;;  %s2664_s17 = sphi %s2744_s17, %s3152_s17  }
   0x4   : > { %s2769_s23 = sadd.s32 1, %s2676_s20   ;;  %s267_s24 = sadd.s32 1, %s2672_s19 }
   0x5   : > { %s264_s25 = ssub.s32 %s2676_s20, %s2769_s23  ;;  %p277_p0 = scmp.ne.s32.totalorder %s2672_s19, %s2668_s18 }
   0x6   : > { %p265_p1 = scmp.eq.s32.totalorder %s264_s25, 0  ;;  %p278_p2 = scmp.eq.s32.totalorder %s2765_s21, 1 }
   0x7   : > { %p283_p3 = scmp.ne.s32.totalorder %s2668_s18, %s2664_s17  ;;  %p284_p4 = scmp.eq.s32.totalorder %s2029_s22, 1 }
   0x8   : > { %s2780_s26 = scalar_select %p265_p1, %s2672_s19, %s267_s24  }
   0x9   : > { %p2782_p5 = por %p278_p2, %p277_p0  ;;  %p2786_p6 = por %p284_p4, %p283_p3 }
   0xa   : > { %3145 = sst [smem:[#allocation5_spill]] %s2780_s26  ;;  %p2032_p7 = scmp.ge.s32.totalorder %s2676_s20, 1 }
   0xb   : > { %p342_p8 = scmp.lt.s32.totalorder %s2676_s20, 3 }
   0xd   : > { %p343_p9 = pnand %p2032_p7, %p342_p8 }
   0xe   : > { %v395_v0 = vld [vmem:[%s3133_s1] sm:$0xff] (!%p343_p9)  ;;  %v396_v1 = vld [vmem:[%s3133_s1 + $0x8] sm:$0xff] (!%p343_p9)  ;;  %v397_v2 = vld [vmem:[%s3133_s1 + $0x10] sm:$0xff] (!%p343_p9)  ;;  %s2034_s16 = sshll.u32 (!%p343_p9), %s2765_s21, 1  ;;  %vm408_vm0 = vcmask (!%p343_p9), 392192   ;;  %v2678_v25 = vmov (!%p343_p9), 0.0   ;;  %v521_v59 = vlaneseq (!%p343_p9) }
   0xf   : > { %346 = sbr.rel (%p343_p9) target bundleno = 2003 (0x7d3), region = 64  ;;  %v2346_v3 = vpack.c.bf16 (!%p343_p9), %v396_v1, %v395_v0  ;;  %v398_v4 = vld [vmem:[%s3133_s1 + $0x18] sm:$0xff] (!%p343_p9)  ;;  %v399_v5 = vld [vmem:[%s3133_s1 + $0x20] sm:$0xff] (!%p343_p9)  ;;  %v400_v6 = vld [vmem:[%s3133_s1 + $0x28] sm:$0xff] (!%p343_p9)  ;;  %p384_p10 = scmp.lt.s32.totalorder (!%p343_p9), %s2034_s16, 3  ;;  %607 = vmatprep.mubr.f32.mxu1 (!%p343_p9), %v2678_v25  ;;  %vm506_vm1 = vcmask (!%p343_p9), 261120  }
  0x10   : > { %v2350_v7 = vpack.c.bf16 (!%p343_p9), %v398_v4, %v397_v2  ;;  %v512_v8 = vld [vmem:[%s3135_s3 + $0x8] sm:$0xff] (!%p343_p9)  ;;  %v514_v9 = vld [vmem:[%s3135_s3 + $0x18] sm:$0xff] (!%p343_p9)  ;;  %v511_v10 = vld [vmem:[%s3135_s3] sm:$0xff] (!%p343_p9)  ;;  %v2354_v14 = vpack.c.bf16 (!%p343_p9), %v400_v6, %v399_v5  ;;  %s3144_s14 = sand.u32 (!%p343_p9), 1, %s2668_s18   ;;  %v522_v60 = vshrl.u32 (!%p343_p9), %v521_v59, 7  ;;  %vm655_vm2 = vcmask (!%p343_p9), 523264  }
  0x11   : > { %2347 = vmatprep.subr.bf16.mxu0 (!%p343_p9), %v2346_v3  ;;  %v2358_v11 = vpack.c.bf16 (!%p343_p9), %v514_v9, %v512_v8  ;;  %v513_v12 = vld [vmem:[%s3135_s3 + $0x10] sm:$0xff] (!%p343_p9)  ;;  %v516_v19 = vld [vmem:[%s3135_s3 + $0x28] sm:$0xff] (!%p343_p9)  ;;  %v518_v20 = vld [vmem:[%s3135_s3 + $0x38] sm:$0xff] (!%p343_p9)  ;;  %s2033_s15 = sshll.u32 (!%p343_p9), %s3144_s14, 5  ;;  %s2679_s24 = smov (!%p343_p9), 64   ;;  %vm820_vm3 = vcmask (!%p343_p9), 785408  }
  0x12   : > { %2349 = vmatpush3.bf16.msra.mxu0 (!%p343_p9), %v2346_v3  ;;  %v2360_v13 = vpack.c.bf16 (!%p343_p9), %v513_v12, %v511_v10  ;;  %v2362_v21 = vpack.c.bf16 (!%p343_p9), %v518_v20, %v516_v19  ;;  %v515_v22 = vld [vmem:[%s3135_s3 + $0x20] sm:$0xff] (!%p343_p9)  ;;  %v517_v23 = vld [vmem:[%s3135_s3 + $0x30] sm:$0xff] (!%p343_p9)  ;;  %v641_v27 = vld [vmem:[%s3137_s5 + $0x8] sm:$0xff] (!%p343_p9)  ;;  %s2856_s12 = scalar_lea.vmem (!%p343_p9), [#allocation2], %s2033_s15  ;;  %v523_v0 = vsub.s32 (!%p343_p9), 0, %v522_v60  ;;  %v527_v2 = vsub.s32 (!%p343_p9), 1, %v522_v60 }
  0x13   : > { %2351 = vmatprep.subr.bf16.mxu0 (!%p343_p9), %v2350_v7  ;;  %2359 = vmatprep.subr.bf16.mxu1 (!%p343_p9), %v2358_v11  ;;  %v2364_v24 = vpack.c.bf16 (!%p343_p9), %v517_v23, %v515_v22  ;;  %v640_v26 = vld [vmem:[%s3137_s5] sm:$0xff] (!%p343_p9)  ;;  %v642_v30 = vld [vmem:[%s3137_s5 + $0x10] sm:$0xff] (!%p343_p9)  ;;  %v643_v31 = vld [vmem:[%s3137_s5 + $0x18] sm:$0xff] (!%p343_p9)  ;;  %s2680_s14 = smov (!%p343_p9), 96   ;;  %vm1325_vm5 = vcmask (!%p343_p9), 130048   ;;  %s2681_s30 = smov (!%p343_p9), [#allocation2]  }
  0x14   : > { %2361 = vmatpush1.bf16.msra.mxu1 (!%p343_p9), %v2360_v13  ;;  %v2366_v28 = vpack.c.bf16 (!%p343_p9), %v641_v27, %v640_v26  ;;  %v2037_v29 = vld [vmem:[%s3134_s2] ss:$0 sm:$0xff] (!%p343_p9)  ;;  %v2370_v36 = vpack.c.bf16 (!%p343_p9), %v643_v31, %v642_v30  ;;  %v645_v42 = vld [vmem:[%s3137_s5 + $0x28] sm:$0xff] (!%p343_p9)  ;;  %v646_v44 = vld [vmem:[%s3137_s5 + $0x30] sm:$0xff] (!%p343_p9) }
  0x15   : > { %2363 = vmatprep.subr.bf16.mxu1 (!%p343_p9), %v2362_v21  ;;  %v644_v41 = vld [vmem:[%s3137_s5 + $0x20] sm:$0xff] (!%p343_p9)  ;;  %v647_v45 = vld [vmem:[%s3137_s5 + $0x38] sm:$0xff] (!%p343_p9)  ;;  %v778_v48 = vld [vmem:[%s3139_s7 + $0x8] sm:$0xff] (!%p343_p9) }
  0x16   : > { %s3157_s16 = smov (!%p384_p10, %s2034_s16), 3  ;;  %2353 = vmatpush3.bf16.msra.mxu0 %v2350_v7  ;;  %v2374_v43 = vpack.c.bf16 %v645_v42, %v644_v41  ;;  %v2378_v46 = vpack.c.bf16 %v647_v45, %v646_v44  ;;  %v777_v47 = vld [vmem:[%s3139_s7] sm:$0xff]  ;;  %v779_v49 = vld [vmem:[%s3139_s7 + $0x10] sm:$0xff]  ;;  %v780_v51 = vld [vmem:[%s3139_s7 + $0x18] sm:$0xff] }
  0x17   : > { %s2103_s29 = sshll.u32 %s3157_s16, 4  ;;  %2355 = vmatprep.subr.bf16.mxu0 %v2354_v14  ;;  %v2382_v50 = vpack.c.bf16 %v778_v48, %v777_v47  ;;  %v2386_v52 = vpack.c.bf16 %v780_v51, %v779_v49  ;;  %v781_v53 = vld [vmem:[%s3139_s7 + $0x20] sm:$0xff]  ;;  %v782_v54 = vld [vmem:[%s3139_s7 + $0x28] sm:$0xff]  ;;  %v783_v56 = vld [vmem:[%s3139_s7 + $0x30] sm:$0xff]  ;;  %s1967_s16 = sshll.u32 %s2856_s12, 4  ;;  %s3083_s16 = int_to_ptr.vmem [resolvable:$true] %s1967_s16 }
  0x18   : > { %s388_s13 = scalar_lea.vmem %s3132_s0, %s2103_s29  ;;  %2365 = vmatpush1.bf16.msra.mxu1 %v2364_v24  ;;  %v2390_v55 = vpack.c.bf16 %v782_v54, %v781_v53  ;;  %v784_v57 = vld [vmem:[%s3139_s7 + $0x38] sm:$0xff]  ;;  %v785_v61 = vld [vmem:[%s3139_s7 + $0x40] sm:$0xff]  ;;  %v786_v62 = vld [vmem:[%s3139_s7 + $0x48] sm:$0xff]  ;;  %s2614_s29 = scalar_lea.vmem %s3083_s16, 512 }
  0x19   : > { %v391_v15 = vld [vmem:[%s388_s13] sm:$0xff]  ;;  %v392_v16 = vld [vmem:[%s388_s13 + $0x8] sm:$0xff]  ;;  %v393_v17 = vld [vmem:[%s388_s13 + $0x10] sm:$0xff]  ;;  %2367 = vmatprep.subr.bf16.mxu1 %v2366_v28  ;;  %v2394_v58 = vpack.c.bf16 %v784_v57, %v783_v56  ;;  %v2398_v63 = vpack.c.bf16 %v786_v62, %v785_v61  ;;  %p2615_p11 = scmp.ne.s32.totalorder %s3083_s16, %s2614_s29 }
  0x1a   : > { %2204 = vmatprep.mubr.msk.f32.mxu0 %vm408_vm0, %v391_v15  ;;  %2357 = vmatpush3.bf16.msra.mxu0 %v2354_v14  ;;  %v394_v18 = vld [vmem:[%s388_s13 + $0x18] sm:$0xff]  ;;  %v519_v1 = vld [vmem:[%s3136_s4] sm:$0x3]  ;;  %v787_v3 = vld [vmem:[%s3139_s7 + $0x50] sm:$0xff]  ;;  %s2618_s13 = sshll.u32 %s2681_s30, 4  ;;  %s2619_s13 = int_to_ptr.vmem [resolvable:$false] %s2618_s13 }
  0x1b   : > { %2383 = vmatprep.subr.bf16.mxu0 %v2382_v50  ;;  %v788_v4 = vld [vmem:[%s3139_s7 + $0x58] sm:$0xff]  ;;  %v524_v6 = vrot.slane %v519_v1, %v523_v0  ;;  %v528_v7 = vrot.slane %v519_v1, %v527_v2  ;;  %vm2986_vm4 = vmpackc.low %vm506_vm1, %vm506_vm1  ;;  %p2616_p12 = pnand %p2615_p11, %p2782_p5  ;;  %p2621_p0 = scmp.lt.s32.totalorder %s3083_s16, %s2619_s13 }
  0x1c   : > { %v2402_v5 = vpack.c.bf16 %v788_v4, %v787_v3 }
  0x1d   : > { %2205 = vmatmul.mubr.msk.f32.vlgmr.msra.gmra.mrb[0].mxu0 %vm408_vm0, %v392_v16  ;;  %p2617_p13 = pneg %p2616_p12 }
  0x1e   : > { %2207 = vmatprep.mubr.msk.f32.mxu0 %vm408_vm0, %v393_v17  ;;  %2385 = vmatpush3.bf16.msra.mxu0 %v2382_v50  ;;  %v2046_v50 = vld [vmem:[%s3138_s6] ss:$0 sm:$0xff] }
  0x1f   : > { %2387 = vmatprep.subr.bf16.mxu0 %v2386_v52 }
  0x21   : > { %2208 = vmatmul.mubr.msk.f32.gmra.mrb[2].mxu0 %vm408_vm0, %v394_v18 }
  0x22   : > { %2389 = vmatpush3.bf16.msra.mxu0 %v2386_v52 }
  0x23   : > { %2391 = vmatprep.subr.bf16.mxu0 %v2390_v55 }
  0x26   : > { %2393 = vmatpush3.bf16.msra.mxu0 %v2390_v55 }
  0x27   : > { %2395 = vmatprep.subr.bf16.mxu0 %v2394_v58 }
  0x2a   : > { %2397 = vmatpush3.bf16.msra.mxu0 %v2394_v58 }
  0x2b   : > { %2399 = vmatprep.subr.bf16.mxu0 %v2398_v63 }
  0x2e   : > { %2401 = vmatpush3.bf16.msra.mxu0 %v2398_v63 }
  0x2f   : > { %2403 = vmatprep.subr.bf16.mxu0 %v2402_v5 }
  0x32   : > { %2405 = vmatpush3.bf16.msra.mxu0 %v2402_v5 }
  0xf0   : > { %v2206_v32 = vpop.f32.mrb[0].mxu0 }
  0xf1   : > { %v493_v33 = vadd.f32 %v2206_v32, %v2037_v29  ;;  %v487_v34 = vpop.f32.mrb[1].mxu0  ;;  %v938_v32 = vld [vmem:[%s3141_s9] sm:$0xff] }
  0xf2   : > { %v488_v35 = vadd.f32 %v2037_v29, %v487_v34 }
  0xf3   : > { %508 = vst.msk [vmem:[%s2856_s12 + $0x8] sm:$0xff] %vm506_vm1, %v493_v33 }
  0xf4   : > { %507 = vst.msk [vmem:[%s2856_s12] sm:$0xff] %vm506_vm1, %v488_v35  ;;  %2042 = vmatmul.mubr.msk.f32.vlgmr.msra.gmra.mrb[0].mxu1 %vm506_vm1, %v488_v35  ;;  %v2209_v37 = vpop.f32.mrb[2].mxu0  ;;  %v940_v35 = vld [vmem:[%s3141_s9 + $0x10] sm:$0xff] }
  0xf5   : > { %613 = vmatprep.mubr.f32.mxu1 %v2678_v25  ;;  %v503_v38 = vadd.f32 %v2209_v37, %v2037_v29  ;;  %v497_v39 = vpop.f32.mrb[3].mxu0  ;;  %2369 = vmatpush3.bf16.msra.mxu1 %v2366_v28 }
  0xf6   : > { %v498_v40 = vadd.f32 %v2037_v29, %v497_v39  ;;  %2371 = vmatprep.subr.bf16.mxu1 %v2370_v36 }
  0xf7   : > { %510 = vst.msk [vmem:[%s2856_s12 + $0x18] sm:$0xff] %vm506_vm1, %v503_v38 }
  0xf8   : > { %2043 = vmatmul.mubr.msk.f32.gmra.mrb[2].mxu1 %vm506_vm1, %v493_v33  ;;  %509 = vst.msk [vmem:[%s2856_s12 + $0x10] sm:$0xff] %vm506_vm1, %v498_v40  ;;  %v939_v33 = vld [vmem:[%s3141_s9 + $0x8] sm:$0xff] }
  0xf9   : > { %619 = vmatprep.mubr.f32.mxu1 %v2678_v25  ;;  %2373 = vmatpush3.bf16.msra.mxu1 %v2370_v36  ;;  %v2406_v34 = vpack.c.bf16 %v939_v33, %v938_v32  ;;  %v941_v36 = vld [vmem:[%s3141_s9 + $0x18] sm:$0xff] }
  0xfa   : > { %2375 = vmatprep.subr.bf16.mxu1 %v2374_v43  ;;  %v2410_v37 = vpack.c.bf16 %v941_v36, %v940_v35  ;;  %v2064_v36 = vld [vmem:[%s3142_s10] ss:$0 sm:$0xff] }
  0xfc   : > { %2044 = vmatmul.mubr.msk.f32.gmra.mrb[4].mxu1 %vm506_vm1, %v498_v40 }
  0xfd   : > { %625 = vmatprep.mubr.f32.mxu1 %v2678_v25  ;;  %2377 = vmatpush3.bf16.msra.mxu1 %v2374_v43 }
  0xfe   : > { %2379 = vmatprep.subr.bf16.mxu1 %v2378_v46 }
 0x100   : > { %2045 = vmatmul.mubr.msk.f32.gmra.mrb[6].mxu1 %vm506_vm1, %v503_v38 }
 0x101   : > { %2381 = vmatpush3.bf16.msra.mxu1 %v2378_v46 }
 0x102   : > { %2407 = vmatprep.subr.bf16.mxu1 %v2406_v34 }
 0x1c7   : > { %v609_v8 = vpop.f32.mrb[0].mxu1 }
 0x1c8   : > { %v610_v9 = vadd.f32 %v609_v8, %v524_v6  ;;  %v611_v10 = vpop.f32.mrb[1].mxu1 }
 0x1c9   : > { %v612_v12 = vadd.f32 %v611_v10, %v528_v7 }
 0x1ca   : > { %v632_v11 = vmax.f32 %v610_v9, 0.0 }
 0x1cb   : > { %v615_v13 = vpop.f32.mrb[2].mxu1  ;;  %v633_v16 = vmax.f32 %v612_v12, 0.0 }
 0x1cc   : > { %v616_v14 = vadd.f32 %v615_v13, %v524_v6  ;;  %v617_v15 = vpop.f32.mrb[3].mxu1  ;;  %800 = vrot.lane.b32.xlu0 %v632_v11, %s2679_s24  ;;  %2226 = vmatprep.mubr.msk.f32.mxu1 %vm655_vm2, %v632_v11  ;;  %v2055_v11 = vld [vmem:[%s3140_s8] ss:$0 sm:$0xff] }
 0x1cd   : > { %v618_v18 = vadd.f32 %v617_v15, %v528_v7 }
 0x1ce   : > { %v634_v17 = vmax.f32 %v616_v14, 0.0 }
 0x1cf   : > { %v621_v19 = vpop.f32.mrb[4].mxu1  ;;  %v635_v23 = vmax.f32 %v618_v18, 0.0 }
 0x1d0   : > { %804 = vrot.lane.b32.xlu1 %v634_v17, %s2679_s24  ;;  %802 = vrot.lane.b32.xlu0 %v633_v16, %s2679_s24  ;;  %v622_v20 = vadd.f32 %v621_v19, %v524_v6  ;;  %v623_v21 = vpop.f32.mrb[5].mxu1 }
 0x1d1   : > { %2227 = vmatmul.mubr.msk.f32.vlgmr.msra.gmra.mrb[8].mxu1 %vm655_vm2, %v634_v17  ;;  %v624_v22 = vadd.f32 %v623_v21, %v528_v7 }
 0x1d2   : > { %v636_v24 = vmax.f32 %v622_v20, 0.0  ;;  %2409 = vmatpush3.bf16.msra.mxu1 %v2406_v34 }
 0x1d3   : > { %v627_v25 = vpop.f32.mrb[6].mxu1  ;;  %v637_v26 = vmax.f32 %v624_v22, 0.0  ;;  %2411 = vmatprep.subr.bf16.mxu1 %v2410_v37 }
 0x1d4   : > { %v628_v27 = vadd.f32 %v627_v25, %v524_v6  ;;  %806 = vrot.lane.b32.xlu1 %v635_v23, %s2679_s24  ;;  %v629_v28 = vpop.f32.mrb[7].mxu1  ;;  %808 = vrot.lane.b32.xlu0 %v636_v24, %s2679_s24 }
 0x1d5   : > { %2229 = vmatprep.mubr.msk.f32.mxu1 %vm655_vm2, %v636_v24  ;;  %v630_v30 = vadd.f32 %v629_v28, %v528_v7 }
 0x1d6   : > { %v638_v29 = vmax.f32 %v628_v27, 0.0  ;;  %2413 = vmatpush3.bf16.msra.mxu1 %v2410_v37 }
 0x1d7   : > { %v639_v31 = vmax.f32 %v630_v30, 0.0  ;;  %2415 = vmatprep.subr.bf16.mxu1 %v2406_v34 }
 0x1d8   : > { %810 = vrot.lane.b32.xlu1 %v637_v26, %s2679_s24  ;;  %2230 = vmatmul.mubr.msk.f32.gmra.mrb[10].mxu1 %vm655_vm2, %v638_v29 }
 0x1d9   : > { %812 = vrot.lane.b32.xlu0 %v638_v29, %s2679_s24 }
 0x1dc   : > { %814 = vrot.lane.b32.xlu1 %v639_v31, %s2679_s24 }
 0x23e   : > { %v801_v38 = vpop.permute.xlu0 %800 }
 0x242   : > { %v805_v39 = vpop.permute.xlu1 %804  ;;  %v803_v40 = vpop.permute.xlu0 %802 }
 0x243   : > { %v816_v41 = vsel %vm655_vm2, %v801_v38, %v803_v40 }
 0x244   : > { %2256 = vmatprep.mubr.msk.f32.mxu0 %vm820_vm3, %v816_v41 }
 0x246   : > { %v807_v42 = vpop.permute.xlu1 %806  ;;  %v809_v44 = vpop.permute.xlu0 %808 }
 0x247   : > { %v817_v43 = vsel %vm655_vm2, %v805_v39, %v807_v42 }
 0x248   : > { %2257 = vmatmul.mubr.msk.f32.vlgmr.msra.gmra.mrb[4].mxu0 %vm820_vm3, %v817_v43 }
 0x24a   : > { %v811_v45 = vpop.permute.xlu1 %810 }
 0x24b   : > { %v818_v46 = vsel %vm655_vm2, %v809_v44, %v811_v45  ;;  %v813_v47 = vpop.permute.xlu0 %812 }
 0x24c   : > { %2259 = vmatprep.mubr.msk.f32.mxu0 %vm820_vm3, %v818_v46 }
 0x24e   : > { %v815_v48 = vpop.permute.xlu1 %814 }
 0x24f   : > { %v819_v49 = vsel %vm655_vm2, %v813_v47, %v815_v48 }
 0x250   : > { %2260 = vmatmul.mubr.msk.f32.gmra.mrb[6].mxu0 %vm820_vm3, %v819_v49 }
 0x2a4   : > { %v2228_v51 = vpop.f32.mrb[8].mxu1 }
 0x2a5   : > { %v740_v52 = vadd.f32 %v2228_v51, %v2046_v50  ;;  %v734_v53 = vpop.f32.mrb[9].mxu1 }
 0x2a6   : > { %v735_v54 = vadd.f32 %v2046_v50, %v734_v53 }
 0x2a7   : > { %v2052_v55 = vmul.f32 -1.442695, %v740_v52 }
 0x2a8   : > { %v2051_v56 = vmul.f32 -1.442695, %v735_v54 }
 0x2a9   : > { %2550 = vpow2.f32 %v2052_v55 }
 0x2aa   : > { %2552 = vpow2.f32 %v2051_v56 }
 0x2ab   : > { %v2231_v57 = vpop.f32.mrb[10].mxu1 }
 0x2ac   : > { %v750_v58 = vadd.f32 %v2231_v57, %v2046_v50  ;;  %v744_v59 = vpop.f32.mrb[11].mxu1 }
 0x2ad   : > { %v745_v60 = vadd.f32 %v2046_v50, %v744_v59 }
 0x2ae   : > { %v2054_v61 = vmul.f32 -1.442695, %v750_v58 }
 0x2af   : > { %v2053_v62 = vmul.f32 -1.442695, %v745_v60 }
 0x2b0   : > { %2554 = vpow2.f32 %v2054_v61 }
 0x2b1   : > { %2556 = vpow2.f32 %v2053_v62 }
 0x2b3   : > { %v2551_v63 = vpop.eup %2550 }
 0x2b4   : > { %v2553_v0 = vpop.eup %2552  ;;  %v766_v1 = vadd.f32 1.0, %v2551_v63 }
 0x2b5   : > { %v765_v2 = vadd.f32 1.0, %v2553_v0 }
 0x2b7   : > { %2558 = vrcp.f32 %v765_v2 }
 0x2b8   : > { %2560 = vrcp.f32 %v766_v1 }
 0x2ba   : > { %v2555_v3 = vpop.eup %2554 }
 0x2bb   : > { %v2557_v4 = vpop.eup %2556  ;;  %v768_v5 = vadd.f32 1.0, %v2555_v3 }
 0x2bc   : > { %v767_v6 = vadd.f32 1.0, %v2557_v4 }
 0x2bd   : > { %2562 = vrcp.f32 %v768_v5 }
 0x2be   : > { %2564 = vrcp.f32 %v767_v6 }
 0x2c1   : > { %v2559_v7 = vpop.eup %2558 }
 0x2c2   : > { %v2561_v8 = vpop.eup %2560  ;;  %2270 = vmatprep.mubr.msk.f32.mxu1 %vm506_vm1, %v2559_v7 }
 0x2c3   : > { %2271 = vmatmul.mubr.msk.f32.vlgmr.msra.gmra.mrb[12].mxu1 %vm506_vm1, %v2561_v8 }
 0x2c4   : > { %2417 = vmatpush3.bf16.msra.mxu1 %v2406_v34 }
 0x2c5   : > { %2419 = vmatprep.subr.bf16.mxu1 %v2410_v37 }
 0x2c7   : > { %v2563_v9 = vpop.eup %2562 }
 0x2c8   : > { %v2565_v10 = vpop.eup %2564  ;;  %2421 = vmatpush3.bf16.msra.mxu1 %v2410_v37 }
 0x2c9   : > { %2273 = vmatprep.mubr.msk.f32.mxu1 %vm506_vm1, %v2565_v10 }
 0x2ca   : > { %2274 = vmatmul.mubr.msk.f32.gmra.mrb[14].mxu1 %vm506_vm1, %v2563_v9 }
 0x31b   : > { %v2258_v12 = vpop.f32.mrb[4].mxu0 }
 0x31c   : > { %v901_v13 = vadd.f32 %v2258_v12, %v2055_v11  ;;  %v895_v14 = vpop.f32.mrb[5].mxu0 }
 0x31d   : > { %v896_v15 = vadd.f32 %v2055_v11, %v895_v14 }
 0x31e   : > { %v2061_v16 = vmul.f32 -1.442695, %v901_v13 }
 0x31f   : > { %v2060_v17 = vmul.f32 -1.442695, %v896_v15 }
 0x320   : > { %2566 = vpow2.f32 %v2061_v16 }
 0x321   : > { %2568 = vpow2.f32 %v2060_v17 }
 0x323   : > { %v2261_v18 = vpop.f32.mrb[6].mxu0 }
 0x324   : > { %v911_v19 = vadd.f32 %v2261_v18, %v2055_v11  ;;  %v905_v20 = vpop.f32.mrb[7].mxu0 }
 0x325   : > { %v906_v21 = vadd.f32 %v2055_v11, %v905_v20 }
 0x326   : > { %v2063_v22 = vmul.f32 -1.442695, %v911_v19 }
 0x327   : > { %v2062_v23 = vmul.f32 -1.442695, %v906_v21 }
 0x328   : > { %2570 = vpow2.f32 %v2063_v22 }
 0x329   : > { %2572 = vpow2.f32 %v2062_v23 }
 0x32a   : > { %v2567_v24 = vpop.eup %2566 }
 0x32b   : > { %v2569_v25 = vpop.eup %2568  ;;  %v927_v26 = vadd.f32 1.0, %v2567_v24 }
 0x32c   : > { %v926_v27 = vadd.f32 1.0, %v2569_v25 }
 0x32e   : > { %2574 = vrcp.f32 %v926_v27 }
 0x32f   : > { %2576 = vrcp.f32 %v927_v26 }
 0x332   : > { %v2571_v28 = vpop.eup %2570 }
 0x333   : > { %v2573_v29 = vpop.eup %2572  ;;  %v929_v30 = vadd.f32 1.0, %v2571_v28 }
 0x334   : > { %v928_v31 = vadd.f32 1.0, %v2573_v29 }
 0x336   : > { %2578 = vrcp.f32 %v928_v31 }
 0x337   : > { %2580 = vrcp.f32 %v929_v30 }
 0x338   : > { %v2575_v32 = vpop.eup %2574 }
 0x339   : > { %v2577_v33 = vpop.eup %2576  ;;  %2284 = vmatprep.mubr.msk.f32.mxu1 %vm506_vm1, %v2575_v32 }
 0x33a   : > { %2285 = vmatmul.mubr.msk.f32.vlgmr.msra.gmra.mrb[16].mxu1 %vm506_vm1, %v2577_v33 }
 0x340   : > { %v2579_v34 = vpop.eup %2578 }
 0x341   : > { %v2581_v35 = vpop.eup %2580  ;;  %2287 = vmatprep.mubr.msk.f32.mxu1 %vm506_vm1, %v2579_v34 }
 0x342   : > { %2288 = vmatmul.mubr.msk.f32.gmra.mrb[18].mxu1 %vm506_vm1, %v2581_v35 }
 0x396   : > { %v2272_v37 = vpop.f32.mrb[12].mxu1 }
 0x397   : > { %v1027_v38 = vpop.f32.mrb[13].mxu1  ;;  %v1033_v46 = vadd.f32 %v2272_v37, %v2064_v36 }
 0x398   : > { %v1028_v39 = vadd.f32 %v2064_v36, %v1027_v38 }
 0x39a   : > { %2294 = vmatprep.mubr.msk.f32.mxu1 %vm506_vm1, %v1028_v39  ;;  %v2975_v49 = vpack.i.bf16 %v1033_v46, %v1028_v39 }
 0x39d   : > { %v2275_v40 = vpop.f32.mrb[14].mxu1 }
 0x39e   : > { %v1037_v41 = vpop.f32.mrb[15].mxu1  ;;  %v1043_v53 = vadd.f32 %v2275_v40, %v2064_v36 }
 0x39f   : > { %v1038_v54 = vadd.f32 %v2064_v36, %v1037_v41 }
 0x3a1   : > { %v2981_v56 = vpack.i.bf16 %v1043_v53, %v1038_v54 }
 0x40d   : > { %v2286_v42 = vpop.f32.mrb[16].mxu1 }
 0x40e   : > { %v1130_v43 = vadd.f32 %v2286_v42, %v2064_v36  ;;  %v1124_v44 = vpop.f32.mrb[17].mxu1 }
 0x40f   : > { %v1125_v45 = vadd.f32 %v2064_v36, %v1124_v44 }
 0x411   : > { %2308 = vmatprep.mubr.msk.f32.mxu0 %vm506_vm1, %v1125_v45  ;;  %v2972_v47 = vpack.i.bf16 %v1130_v43, %v1125_v45 }
 0x413   : > { %2511 = vrot.lane.b32.xlu0 %v2972_v47, %s2680_s14 }
 0x415   : > { %v2289_v48 = vpop.f32.mrb[18].mxu1 }
 0x416   : > { %v1140_v50 = vadd.f32 %v2289_v48, %v2064_v36  ;;  %v1134_v51 = vpop.f32.mrb[19].mxu1 }
 0x417   : > { %v1135_v52 = vadd.f32 %v2064_v36, %v1134_v51  ;;  %2521 = vrot.lane.b32.xlu0 %v2975_v49, %s2680_s14 }
 0x419   : > { %v2978_v55 = vpack.i.bf16 %v1140_v50, %v1135_v52 }
 0x41b   : > { %2516 = vrot.lane.b32.xlu1 %v2978_v55, %s2680_s14 }
 0x41f   : > { %2526 = vrot.lane.b32.xlu1 %v2981_v56, %s2680_s14  ;;  %s2620_s14 = scalar_lea.vmem %s2619_s13, 1024 }
 0x420   : > { %p2622_p1 = scmp.lt.s32.totalorder %s2620_s14, %s2614_s29 }
 0x422   : > { %p2623_p2 = por %p2622_p1, %p2621_p0 }
 0x424   : > { %p2624_p3 = pnand %p2623_p2, %p2617_p13 }
 0x485   : > { %v2512_v57 = vpop.permute.xlu0 %2511 }
 0x486   : > { %v2514_v58 = vunpack.i.h.bf16 %v2512_v57  ;;  %v2513_v59 = vunpack.i.l.bf16 %v2512_v57 }
 0x488   : > { %v2422_v61 = vpack.c.bf16 %v2514_v58, %v2513_v59 }
 0x489   : > { %v2522_v62 = vpop.permute.xlu0 %2521 }
 0x48a   : > { %v2524_v63 = vunpack.i.h.bf16 %v2522_v62  ;;  %v2523_v0 = vunpack.i.l.bf16 %v2522_v62  ;;  %2424 = vmatprep.subr.msk.bf16.mxu1 %vm2986_vm4, %v2422_v61 }
 0x48b   : > { %2427 = vmatpush3.bf16.xpose.msk.msra.mxu1 %vm2986_vm4, %v2422_v61 }
 0x48c   : > { %v2434_v1 = vpack.c.bf16 %v2524_v63, %v2523_v0 }
 0x48d   : > { %v2517_v2 = vpop.permute.xlu1 %2516 }
 0x48e   : > { %v2519_v3 = vunpack.i.h.bf16 %v2517_v2  ;;  %v2518_v4 = vunpack.i.l.bf16 %v2517_v2  ;;  %2436 = vmatprep.subr.msk.bf16.mxu0 %vm2986_vm4, %v2434_v1 }
 0x48f   : > { %2439 = vmatpush3.bf16.xpose.msk.msra.mxu0 %vm2986_vm4, %v2434_v1 }
 0x490   : > { %v2428_v5 = vpack.c.bf16 %v2519_v3, %v2518_v4 }
 0x491   : > { %v2527_v6 = vpop.permute.xlu1 %2526 }
 0x492   : > { %v2529_v7 = vunpack.i.h.bf16 %v2527_v6  ;;  %v2528_v8 = vunpack.i.l.bf16 %v2527_v6  ;;  %2295 = vmatmul.mubr.msk.f32.vlgmr.msra.gmra.mrb[20].mxu1 %vm506_vm1, %v1033_v46  ;;  %2430 = vmatprep.subr.msk.bf16.mxu1 %vm2986_vm4, %v2428_v5 }
 0x493   : > { %2433 = vmatpush3.bf16.xpose.msk.msra.mxu1 %vm2986_vm4, %v2428_v5  ;;  %2301 = vmatprep.mubr.msk.f32.mxu1 %vm506_vm1, %v1038_v54 }
 0x494   : > { %v2440_v9 = vpack.c.bf16 %v2529_v7, %v2528_v8 }
 0x496   : > { %2309 = vmatmul.mubr.msk.f32.vlgmr.msra.gmra.mrb[8].mxu0 %vm506_vm1, %v1130_v43  ;;  %2442 = vmatprep.subr.msk.bf16.mxu1 %vm2986_vm4, %v2440_v9 }
 0x49a   : > { %2302 = vmatmul.mubr.msk.f32.vlgmr.msra.gmra.mrb[22].mxu1 %vm506_vm1, %v1043_v53 }
 0x49b   : > { %2445 = vmatpush3.bf16.xpose.msk.msra.mxu1 %vm2986_vm4, %v2440_v9  ;;  %2315 = vmatprep.mubr.msk.f32.mxu1 %vm506_vm1, %v1135_v52 }
 0x4a2   : > { %2316 = vmatmul.mubr.msk.f32.vlgmr.msra.gmra.mrb[24].mxu1 %vm506_vm1, %v1140_v50 }
 0x565   : > { %v3012_v10 = vpop.f32.mrb[20].mxu1 }
 0x566   : > { %v1225_v11 = vpop.f32.mrb[21].mxu1  ;;  %v1329_v24 = vsel %vm1325_vm5, %v3012_v10, -inf }
 0x567   : > { %v1326_v18 = vsel %vm1325_vm5, %v1225_v11, -inf }
 0x569   : > { %v2310_v12 = vpop.f32.mrb[8].mxu0 }
 0x56a   : > { %v1448_v13 = vpop.f32.mrb[9].mxu0  ;;  %v1547_v14 = vsel %vm1325_vm5, %v2310_v12, -inf }
 0x56b   : > { %1548 = vmax.xlane.f32.xlu1 %v1547_v14  ;;  %v1544_v15 = vsel %vm1325_vm5, %v1448_v13, -inf }
 0x56c   : > { %1545 = vmax.xlane.f32.xlu0 %v1544_v15 }
 0x56d   : > { %v2303_v16 = vpop.f32.mrb[22].mxu1 }
 0x56e   : > { %v1316_v17 = vpop.f32.mrb[23].mxu1  ;;  %v1335_v25 = vsel %vm1325_vm5, %v2303_v16, -inf }
 0x56f   : > { %1327 = vmax.xlane.f32.xlu1 %v1326_v18  ;;  %v1332_v19 = vsel %vm1325_vm5, %v1316_v17, -inf }
 0x573   : > { %1333 = vmax.xlane.f32.xlu1 %v1332_v19 }
 0x575   : > { %v2317_v20 = vpop.f32.mrb[24].mxu1 }
 0x576   : > { %v3018_v21 = vpop.f32.mrb[25].mxu1  ;;  %v1553_v23 = vsel %vm1325_vm5, %v2317_v20, -inf }
 0x577   : > { %v1550_v22 = vsel %vm1325_vm5, %v3018_v21, -inf }
 0x578   : > { %1551 = vmax.xlane.f32.xlu0 %v1550_v22 }
 0x57c   : > { %1554 = vmax.xlane.f32.xlu0 %v1553_v23 }
 0x580   : > { %1330 = vmax.xlane.f32.xlu0 %v1329_v24 }
 0x584   : > { %1336 = vmax.xlane.f32.xlu0 %v1335_v25  ;;  %2531 = vrot.lane.b32.xlu1 %v2975_v49, %s2679_s24 }
 0x5f8   : > { %v1549_v26 = vpop.xlane.xlu1 %1548 }
 0x5f9   : > { %v1557_v27 = vsub.f32 %v2310_v12, %v1549_v26  ;;  %v1546_v28 = vpop.xlane.xlu0 %1545 }
 0x5fa   : > { %v1556_v29 = vsub.f32 %v1448_v13, %v1546_v28 }
 0x5fb   : > { %v1562_v30 = vmul.f32 1.442695, %v1557_v27 }
 0x5fc   : > { %v1560_v31 = vmul.f32 1.442695, %v1556_v29  ;;  %v1328_v32 = vpop.xlane.xlu1 %1327 }
 0x5fd   : > { %2582 = vpow2.f32 %v1562_v30  ;;  %v1338_v33 = vsub.f32 %v1225_v11, %v1328_v32 }
 0x5fe   : > { %2584 = vpow2.f32 %v1560_v31 }
 0x5ff   : > { %v1342_v34 = vmul.f32 1.442695, %v1338_v33 }
 0x600   : > { %v1334_v35 = vpop.xlane.xlu1 %1333 }
 0x601   : > { %2586 = vpow2.f32 %v1342_v34  ;;  %v1340_v36 = vsub.f32 %v1316_v17, %v1334_v35 }
 0x603   : > { %v1346_v37 = vmul.f32 1.442695, %v1340_v36 }
 0x604   : > { %v2532_v38 = vpop.permute.xlu1 %2531 }
 0x605   : > { %2588 = vpow2.f32 %v1346_v37  ;;  %v2534_v39 = vunpack.i.h.bf16 %v2532_v38  ;;  %v2533_v40 = vunpack.i.l.bf16 %v2532_v38  ;;  %v1552_v41 = vpop.xlane.xlu0 %1551 }
 0x606   : > { %v1558_v5 = vsub.f32 %v3018_v21, %v1552_v41 }
 0x607   : > { %v2583_v42 = vpop.eup %2582  ;;  %v2446_v43 = vpack.c.bf16 %v2534_v39, %v2533_v40 }
 0x608   : > { %v2585_v44 = vpop.eup %2584  ;;  %v1571_v45 = vsel %vm1325_vm5, %v2583_v42, 0.0  ;;  %v1564_v6 = vmul.f32 1.442695, %v1558_v5 }
 0x609   : > { %1572 = vadd.xlane.f32.xlu0 %v1571_v45  ;;  %v1555_v46 = vpop.xlane.xlu0 %1554  ;;  %2447 = vmatprep.subr.bf16.mxu0 %v2446_v43  ;;  %v1568_v48 = vsel %vm1325_vm5, %v2585_v44, 0.0  ;;  %v1941_v45 = vld [vmem:[%s2856_s12 + $0x8] sm:$0xff] }
 0x60a   : > { %1569 = vadd.xlane.f32.xlu1 %v1568_v48  ;;  %2449 = vmatpush3.bf16.msra.mxu0 %v2446_v43  ;;  %v1559_v54 = vsub.f32 %v2317_v20, %v1555_v46 }
 0x60b   : > { %v3030_v49 = vpop.eup %2586 }
 0x60c   : > { %v1350_v50 = vsel %vm1325_vm5, %v3030_v49, 0.0  ;;  %v1566_v61 = vmul.f32 1.442695, %v1559_v54  ;;  %v1943_v54 = vld [vmem:[%s2856_s12 + $0x18] sm:$0xff] }
 0x60d   : > { %v1331_v51 = vpop.xlane.xlu0 %1330 }
 0x60e   : > { %v1339_v52 = vsub.f32 %v3012_v10, %v1331_v51  ;;  %1351 = vadd.xlane.f32.xlu1 %v1350_v50 }
 0x60f   : > { %v3035_v53 = vpop.eup %2588 }
 0x610   : > { %v1344_v57 = vmul.f32 1.442695, %v1339_v52  ;;  %v1356_v58 = vsel %vm1325_vm5, %v3035_v53, 0.0 }
 0x611   : > { %v1337_v59 = vpop.xlane.xlu0 %1336 }
 0x612   : > { %2590 = vpow2.f32 %v1344_v57  ;;  %v1341_v60 = vsub.f32 %v2303_v16, %v1337_v59  ;;  %1357 = vadd.xlane.f32.xlu1 %v1356_v58  ;;  %v1942_v59 = vld [vmem:[%s2856_s12 + $0x10] sm:$0xff] }
 0x614   : > { %v1348_v62 = vmul.f32 1.442695, %v1341_v60 }
 0x616   : > { %2592 = vpow2.f32 %v1348_v62 }
 0x617   : > { %2594 = vpow2.f32 %v1566_v61 }
 0x618   : > { %2596 = vpow2.f32 %v1564_v6 }
 0x61c   : > { %v3039_v63 = vpop.eup %2590 }
 0x61d   : > { %v1353_v0 = vsel %vm1325_vm5, %v3039_v63, 0.0 }
 0x61e   : > { %1354 = vadd.xlane.f32.xlu0 %v1353_v0 }
 0x620   : > { %v3043_v1 = vpop.eup %2592 }
 0x621   : > { %v1359_v2 = vsel %vm1325_vm5, %v3043_v1, 0.0  ;;  %v2595_v3 = vpop.eup %2594 }
 0x622   : > { %1360 = vadd.xlane.f32.xlu0 %v1359_v2  ;;  %v1577_v4 = vsel %vm1325_vm5, %v2595_v3, 0.0  ;;  %v2597_v7 = vpop.eup %2596 }
 0x623   : > { %2541 = vrot.lane.b32.xlu1 %v2972_v47, %s2679_s24  ;;  %v1574_v8 = vsel %vm1325_vm5, %v2597_v7, 0.0 }
 0x626   : > { %1578 = vadd.xlane.f32.xlu0 %v1577_v4 }
 0x63c   : > { %2536 = vrot.lane.b32.xlu0 %v2981_v56, %s2679_s24 }
 0x647   : > { %1575 = vadd.xlane.f32.xlu1 %v1574_v8 }
 0x658   : > { %2546 = vrot.lane.b32.xlu1 %v2978_v55, %s2679_s24  ;;  %s2105_s24 = sshll.u32 %s2765_s21, 9  ;;  %s3150_s21 = sand.u32 1, %s2668_s18  }
 0x659   : > { %s3081_s26 = scalar_lea.hbm %s3143_s11, %s2105_s24  ;;  %s3091_s25 = scalar_lea.sflag [#allocation3], %s3150_s21 }
 0x696   : > { %v1573_v9 = vpop.xlane.xlu0 %1572 }
 0x697   : > { %2598 = vrcp.f32 %v1573_v9  ;;  %v1570_v47 = vpop.xlane.xlu1 %1569 }
 0x698   : > { %2600 = vrcp.f32 %v1570_v47 }
 0x69b   : > { %v1352_v56 = vpop.xlane.xlu1 %1351 }
 0x69c   : > { %2602 = vrcp.f32 %v1352_v56 }
 0x69f   : > { %v1358_v15 = vpop.xlane.xlu1 %1357 }
 0x6a1   : > { %v2599_v10 = vpop.eup %2598 }
 0x6a2   : > { %v2601_v11 = vpop.eup %2600  ;;  %v1583_v13 = vmul.f32 %v2599_v10, %v2583_v42 }
 0x6a3   : > { %v1581_v12 = vmul.f32 %v2601_v11, %v2585_v44  ;;  %v2542_v18 = vpop.permute.xlu1 %2541 }
 0x6a4   : > { %v2544_v55 = vunpack.i.h.bf16 %v2542_v18  ;;  %v2543_v20 = vunpack.i.l.bf16 %v2542_v18 }
 0x6a5   : > { %2322 = vmatprep.mubr.msk.f32.mxu0 %vm1325_vm5, %v1581_v12 }
 0x6a6   : > { %2323 = vmatmul.mubr.msk.f32.vlgmr.msra.gmra.mrb[10].mxu0 %vm1325_vm5, %v1583_v13  ;;  %v2454_v24 = vpack.c.bf16 %v2544_v55, %v2543_v20  ;;  %v2603_v27 = vpop.eup %2602 }
 0x6a7   : > { %v1363_v35 = vmul.f32 %v2603_v27, %v3030_v49  ;;  %v1940_v49 = vld [vmem:[%s2856_s12] sm:$0xff] }
 0x6ab   : > { %v1355_v14 = vpop.xlane.xlu0 %1354 }
 0x6af   : > { %v1361_v16 = vpop.xlane.xlu0 %1360 }
 0x6b3   : > { %v1579_v17 = vpop.xlane.xlu0 %1578 }
 0x6b4   : > { %2604 = vrcp.f32 %v1579_v17 }
 0x6b7   : > { %v2537_v19 = vpop.permute.xlu0 %2536 }
 0x6b8   : > { %v2539_v21 = vunpack.i.h.bf16 %v2537_v19  ;;  %v2538_v22 = vunpack.i.l.bf16 %v2537_v19 }
 0x6ba   : > { %v2450_v23 = vpack.c.bf16 %v2539_v21, %v2538_v22 }
 0x6bc   : > { %2451 = vmatprep.subr.bf16.mxu0 %v2450_v23 }
 0x6bd   : > { %2453 = vmatpush3.bf16.msra.mxu0 %v2450_v23 }
 0x6be   : > { %2455 = vmatprep.subr.bf16.mxu0 %v2454_v24  ;;  %v2605_v28 = vpop.eup %2604 }
 0x6bf   : > { %v1587_v33 = vmul.f32 %v2605_v28, %v2595_v3 }
 0x6d4   : > { %v1576_v25 = vpop.xlane.xlu1 %1575 }
 0x6d5   : > { %2606 = vrcp.f32 %v1576_v25 }
 0x6d6   : > { %2608 = vrcp.f32 %v1355_v14 }
 0x6d7   : > { %2610 = vrcp.f32 %v1358_v15 }
 0x6d8   : > { %2612 = vrcp.f32 %v1361_v16  ;;  %v2547_v26 = vpop.permute.xlu1 %2546 }
 0x6d9   : > { %v2549_v30 = vunpack.i.h.bf16 %v2547_v26  ;;  %v2548_v31 = vunpack.i.l.bf16 %v2547_v26 }
 0x6db   : > { %v2458_v37 = vpack.c.bf16 %v2549_v30, %v2548_v31 }
 0x6df   : > { %v2607_v29 = vpop.eup %2606 }
 0x6e0   : > { %v1585_v32 = vmul.f32 %v2607_v29, %v2597_v7  ;;  %v2609_v34 = vpop.eup %2608 }
 0x6e1   : > { %v2611_v36 = vpop.eup %2610  ;;  %v1365_v38 = vmul.f32 %v2609_v34, %v3039_v63 }
 0x6e2   : > { %2329 = vmatprep.mubr.msk.f32.mxu0 %vm1325_vm5, %v1585_v32  ;;  %v2613_v39 = vpop.eup %2612  ;;  %v1367_v40 = vmul.f32 %v2611_v36, %v3035_v53 }
 0x6e3   : > { %2330 = vmatmul.mubr.msk.f32.vlgmr.msra.gmra.mrb[12].mxu0 %vm1325_vm5, %v1587_v33  ;;  %v1369_v41 = vmul.f32 %v2613_v39, %v3043_v1 }
 0x6e4   : > { %2457 = vmatpush3.bf16.msra.mxu0 %v2454_v24  ;;  %2336 = vmatprep.mubr.msk.f32.mxu0 %vm1325_vm5, %v1363_v35 }
 0x6e5   : > { %2459 = vmatprep.subr.bf16.mxu0 %v2458_v37 }
 0x6e7   : > { %2337 = vmatmul.mubr.msk.f32.vlgmr.msra.gmra.mrb[10].mxu0 %vm1325_vm5, %v1365_v38 }
 0x6e8   : > { %2461 = vmatpush3.bf16.msra.mxu0 %v2458_v37  ;;  %2343 = vmatprep.mubr.msk.f32.mxu0 %vm1325_vm5, %v1367_v40 }
 0x6eb   : > { %2344 = vmatmul.mubr.msk.f32.vlgmr.msra.gmra.mrb[12].mxu0 %vm1325_vm5, %v1369_v41 }
 0x7ba   : > { %v2338_v42 = vpop.f32.mrb[10].mxu0 }
 0x7bb   : > { %v1937_v43 = vmul.f32 0.3, %v2338_v42  ;;  %v1840_v44 = vpop.f32.mrb[11].mxu0 }
 0x7bc   : > { %v1936_v46 = vmul.f32 0.3, %v1840_v44 }
 0x7bd   : > { %v1945_v48 = vadd.f32 %v1941_v45, %v1937_v43 }
 0x7be   : > { %v1944_v50 = vadd.f32 %v1940_v49, %v1936_v46  ;;  %v2345_v51 = vpop.f32.mrb[12].mxu0 }
 0x7bf   : > { %1949 = vst.msk [vmem:[%s2856_s12 + $0x8] sm:$0xff] %vm506_vm1, %v1945_v48  ;;  %v1939_v52 = vmul.f32 0.3, %v2345_v51  ;;  %v1927_v53 = vpop.f32.mrb[13].mxu0 }
 0x7c0   : > { %1948 = vst.msk [vmem:[%s2856_s12] sm:$0xff] %vm506_vm1, %v1944_v50  ;;  %v1938_v57 = vmul.f32 0.3, %v1927_v53 }
 0x7c1   : > { %v1947_v58 = vadd.f32 %v1943_v54, %v1939_v52 }
 0x7c2   : > { %v1946_v60 = vadd.f32 %v1942_v59, %v1938_v57 }
 0x7c3   : > { %1951 = vst.msk [vmem:[%s2856_s12 + $0x18] sm:$0xff] %vm506_vm1, %v1947_v58 }
 0x7c4   : > { %1950 = vst.msk [vmem:[%s2856_s12 + $0x10] sm:$0xff] %vm506_vm1, %v1946_v60 }
 0x7c5   : > { %2627 = shalt.err (!%p2624_p3)
}
 0x7c6   : > { %s2628_s12 = scalar_lea.hbm %s3081_s26, 512  ;;  %s2632_s22 = scalar_lea.hbm %s3143_s11, 1024 }
 0x7c7   : > { %p2629_p4 = scmp.ne.s32.totalorder %s3081_s26, %s2628_s12  ;;  %p2633_p9 = scmp.lt.u32.totalorder %s3081_s26, %s3143_s11 }
 0x7c8   : > { %p2634_p10 = scmp.lt.u32.totalorder %s2632_s22, %s2628_s12  ;;  %p2636_p12 = scmp.lt.u32.totalorder %s2628_s12, %s3081_s26 }
 0x7c9   : > { %p2630_p7 = pnand %p2629_p4, %p2782_p5 }
 0x7ca   : > { %p2635_p11 = por %p2634_p10, %p2633_p9 }
 0x7cb   : > { %p2631_p8 = pneg %p2630_p7 }
 0x7cc   : > { %p2637_p13 = por %p2636_p12, %p2635_p11 }
 0x7ce   : > { %p2638_p0 = pnand %p2637_p13, %p2631_p8 }
 0x7d0   : > { %2641 = shalt.err (!%p2638_p0)
}
 0x7d1   : > { %s2682_s29 = smov 128   ;;  %s2683_s13 = smov 8  }
 0x7d2   : > { %2466 = dma.vmem_to_hbm [thread:$0]  (%p2782_p5), %s3083_s16, 512, %s3081_s26, %s3091_s25, %s2682_s29, %s2682_s29, %s2683_s13  }
 0x7d3 PF: > { %p2472_p1 = scmp.ge.s32.totalorder %s2676_s20, 2  ;;  %s1982_s14 = sand.u32 1, %s2664_s17  }
 0x7d4   : > { %s1983_s12 = scalar_lea.sflag [#allocation3], %s1982_s14 }
 0x7d5   : > { %p2469_p2 = pnand %p2472_p1, %p2786_p6 }
 0x7d7   : > { %2659 = dma.done.wait (!%p2469_p2), %s1983_s12, 512  }
 0x7d8   : > { %2661 = vsyncadd (!%p2469_p2), %s1983_s12, 4294966784  ;;  %s3151_s24 = sld [smem:[#allocation5_spill]]  ;;  %p21_p3 = scmp.ge.s32.totalorder %s2769_s23, 4  }
 0x7d9   : > { %s3152_s17 = smov %s2668_s18  ;;  %s3153_s18 = smov %s2672_s19 }
 0x7da   : > { %s3155_s20 = smov %s2769_s23  ;;  %23 = sbr.rel (!%p21_p3) target bundleno = 3 (0x3), region = 99 }
 0x7de   : > { %s3154_s19 = smov %s3151_s24 }
 0x7e1   :  { %1988 = vsyncpa [#allocation3], 1 }
 0x7e2   :  { %1990 = vsyncpa [#allocation3 + $0x1], 1 }

// kernel: tpu_custom_call.1
= control target key start
LH: loop header
LB: loop body
LE: loop exit
PB: predicated region body
PF: predicated region fallthrough
CT: control target
= control target key end

     0   :  { %16 = vsyncpa [#allocation3], 0  ;;  %s3132_s0 = inlined_call_operand.vmem [shape: f32[4,16,48], index: 0, kind: input, shape index: {}]   ;;  %s3133_s1 = inlined_call_operand.vmem [shape: f32[48,32], index: 1, kind: input, shape index: {}]   ;;  %s3134_s2 = inlined_call_operand.vmem [shape: f32[1,32], index: 2, kind: input, shape index: {}]   ;;  %s3135_s3 = inlined_call_operand.vmem [shape: f32[32,160], index: 3, kind: input, shape index: {}]   ;;  %s3136_s4 = inlined_call_operand.vmem [shape: f32[1,160], index: 4, kind: input, shape index: {}]   ;;  %s3137_s5 = inlined_call_operand.vmem [shape: f32[64,32], index: 5, kind: input, shape index: {}]   ;;  %s3138_s6 = inlined_call_operand.vmem [shape: f32[1,32], index: 6, kind: input, shape index: {}]   ;;  %s3139_s7 = inlined_call_operand.vmem [shape: f32[96,32], index: 7, kind: input, shape index: {}]   ;;  %s3140_s8 = inlined_call_operand.vmem [shape: f32[1,32], index: 8, kind: input, shape index: {}]   ;;  %s3141_s9 = inlined_call_operand.vmem [shape: f32[32,96], index: 9, kind: input, shape index: {}]   ;;  %s3142_s10 = inlined_call_operand.vmem [shape: f32[1,96], index: 10, kind: input, shape index: {}]   ;;  %s3143_s11 = inlined_call_operand.hbm [shape: f32[4,16,32], index: 11, kind: output, shape index: {}]  }
   0x1   :  { %18 = vsyncpa [#allocation3 + $0x1], 0  ;;  %s2744_s17 = smov 0   ;;  %s2746_s18 = smov 0  }
   0x2   :  { %s2748_s19 = smov 0   ;;  %s2750_s20 = smov 0  }
   0x3 LB: > { %s2765_s21 = sadd.s32 4294967295, %s2676_s20   ;;  %s2029_s22 = sadd.s32 4294967294, %s2676_s20   ;;  %s2676_s20 = sphi %s2750_s20, %s3155_s20   ;;  %s2672_s19 = sphi %s2748_s19, %s3154_s19   ;;  %s2668_s18 = sphi %s2746_s18, %s3153_s18   ;;  %s2664_s17 = sphi %s2744_s17, %s3152_s17  }
   0x4   : > { %s2769_s23 = sadd.s32 1, %s2676_s20   ;;  %s267_s24 = sadd.s32 1, %s2672_s19 }
   0x5   : > { %s264_s25 = ssub.s32 %s2676_s20, %s2769_s23  ;;  %p277_p0 = scmp.ne.s32.totalorder %s2672_s19, %s2668_s18 }
   0x6   : > { %p265_p1 = scmp.eq.s32.totalorder %s264_s25, 0  ;;  %p278_p2 = scmp.eq.s32.totalorder %s2765_s21, 1 }
   0x7   : > { %p283_p3 = scmp.ne.s32.totalorder %s2668_s18, %s2664_s17  ;;  %p284_p4 = scmp.eq.s32.totalorder %s2029_s22, 1 }
   0x8   : > { %s2780_s26 = scalar_select %p265_p1, %s2672_s19, %s267_s24  }
   0x9   : > { %p2782_p5 = por %p278_p2, %p277_p0  ;;  %p2786_p6 = por %p284_p4, %p283_p3 }
   0xa   : > { %3145 = sst [smem:[#allocation5_spill]] %s2780_s26  ;;  %p2032_p7 = scmp.ge.s32.totalorder %s2676_s20, 1 }
   0xb   : > { %p342_p8 = scmp.lt.s32.totalorder %s2676_s20, 3 }
   0xd   : > { %p343_p9 = pnand %p2032_p7, %p342_p8 }
   0xe   : > { %v395_v0 = vld [vmem:[%s3133_s1] sm:$0xff] (!%p343_p9)  ;;  %v396_v1 = vld [vmem:[%s3133_s1 + $0x8] sm:$0xff] (!%p343_p9)  ;;  %v397_v2 = vld [vmem:[%s3133_s1 + $0x10] sm:$0xff] (!%p343_p9)  ;;  %s2034_s16 = sshll.u32 (!%p343_p9), %s2765_s21, 1  ;;  %vm408_vm0 = vcmask (!%p343_p9), 392192   ;;  %v2678_v25 = vmov (!%p343_p9), 0.0   ;;  %v521_v59 = vlaneseq (!%p343_p9) }
   0xf   : > { %346 = sbr.rel (%p343_p9) target bundleno = 2003 (0x7d3), region = 64  ;;  %v2346_v3 = vpack.c.bf16 (!%p343_p9), %v396_v1, %v395_v0  ;;  %v398_v4 = vld [vmem:[%s3133_s1 + $0x18] sm:$0xff] (!%p343_p9)  ;;  %v399_v5 = vld [vmem:[%s3133_s1 + $0x20] sm:$0xff] (!%p343_p9)  ;;  %v400_v6 = vld [vmem:[%s3133_s1 + $0x28] sm:$0xff] (!%p343_p9)  ;;  %p384_p10 = scmp.lt.s32.totalorder (!%p343_p9), %s2034_s16, 3  ;;  %607 = vmatprep.mubr.f32.mxu1 (!%p343_p9), %v2678_v25  ;;  %vm506_vm1 = vcmask (!%p343_p9), 261120  }
  0x10   : > { %v2350_v7 = vpack.c.bf16 (!%p343_p9), %v398_v4, %v397_v2  ;;  %v512_v8 = vld [vmem:[%s3135_s3 + $0x8] sm:$0xff] (!%p343_p9)  ;;  %v514_v9 = vld [vmem:[%s3135_s3 + $0x18] sm:$0xff] (!%p343_p9)  ;;  %v511_v10 = vld [vmem:[%s3135_s3] sm:$0xff] (!%p343_p9)  ;;  %v2354_v14 = vpack.c.bf16 (!%p343_p9), %v400_v6, %v399_v5  ;;  %s3144_s14 = sand.u32 (!%p343_p9), 1, %s2668_s18   ;;  %v522_v60 = vshrl.u32 (!%p343_p9), %v521_v59, 7  ;;  %vm655_vm2 = vcmask (!%p343_p9), 523264  }
  0x11   : > { %2347 = vmatprep.subr.bf16.mxu0 (!%p343_p9), %v2346_v3  ;;  %v2358_v11 = vpack.c.bf16 (!%p343_p9), %v514_v9, %v512_v8  ;;  %v513_v12 = vld [vmem:[%s3135_s3 + $0x10] sm:$0xff] (!%p343_p9)  ;;  %v516_v19 = vld [vmem:[%s3135_s3 + $0x28] sm:$0xff] (!%p343_p9)  ;;  %v518_v20 = vld [vmem:[%s3135_s3 + $0x38] sm:$0xff] (!%p343_p9)  ;;  %s2033_s15 = sshll.u32 (!%p343_p9), %s3144_s14, 5  ;;  %s2679_s24 = smov (!%p343_p9), 64   ;;  %vm820_vm3 = vcmask (!%p343_p9), 785408  }
  0x12   : > { %2349 = vmatpush3.bf16.msra.mxu0 (!%p343_p9), %v2346_v3  ;;  %v2360_v13 = vpack.c.bf16 (!%p343_p9), %v513_v12, %v511_v10  ;;  %v2362_v21 = vpack.c.bf16 (!%p343_p9), %v518_v20, %v516_v19  ;;  %v515_v22 = vld [vmem:[%s3135_s3 + $0x20] sm:$0xff] (!%p343_p9)  ;;  %v517_v23 = vld [vmem:[%s3135_s3 + $0x30] sm:$0xff] (!%p343_p9)  ;;  %v641_v27 = vld [vmem:[%s3137_s5 + $0x8] sm:$0xff] (!%p343_p9)  ;;  %s2856_s12 = scalar_lea.vmem (!%p343_p9), [#allocation2], %s2033_s15  ;;  %v523_v0 = vsub.s32 (!%p343_p9), 0, %v522_v60  ;;  %v527_v2 = vsub.s32 (!%p343_p9), 1, %v522_v60 }
  0x13   : > { %2351 = vmatprep.subr.bf16.mxu0 (!%p343_p9), %v2350_v7  ;;  %2359 = vmatprep.subr.bf16.mxu1 (!%p343_p9), %v2358_v11  ;;  %v2364_v24 = vpack.c.bf16 (!%p343_p9), %v517_v23, %v515_v22  ;;  %v640_v26 = vld [vmem:[%s3137_s5] sm:$0xff] (!%p343_p9)  ;;  %v642_v30 = vld [vmem:[%s3137_s5 + $0x10] sm:$0xff] (!%p343_p9)  ;;  %v643_v31 = vld [vmem:[%s3137_s5 + $0x18] sm:$0xff] (!%p343_p9)  ;;  %s2680_s14 = smov (!%p343_p9), 96   ;;  %vm1325_vm5 = vcmask (!%p343_p9), 130048   ;;  %s2681_s30 = smov (!%p343_p9), [#allocation2]  }
  0x14   : > { %2361 = vmatpush1.bf16.msra.mxu1 (!%p343_p9), %v2360_v13  ;;  %v2366_v28 = vpack.c.bf16 (!%p343_p9), %v641_v27, %v640_v26  ;;  %v2037_v29 = vld [vmem:[%s3134_s2] ss:$0 sm:$0xff] (!%p343_p9)  ;;  %v2370_v36 = vpack.c.bf16 (!%p343_p9), %v643_v31, %v642_v30  ;;  %v645_v42 = vld [vmem:[%s3137_s5 + $0x28] sm:$0xff] (!%p343_p9)  ;;  %v646_v44 = vld [vmem:[%s3137_s5 + $0x30] sm:$0xff] (!%p343_p9) }
  0x15   : > { %2363 = vmatprep.subr.bf16.mxu1 (!%p343_p9), %v2362_v21  ;;  %v644_v41 = vld [vmem:[%s3137_s5 + $0x20] sm:$0xff] (!%p343_p9)  ;;  %v647_v45 = vld [vmem:[%s3137_s5 + $0x38] sm:$0xff] (!%p343_p9)  ;;  %v778_v48 = vld [vmem:[%s3139_s7 + $0x8] sm:$0xff] (!%p343_p9) }
  0x16   : > { %s3157_s16 = smov (!%p384_p10, %s2034_s16), 3  ;;  %2353 = vmatpush3.bf16.msra.mxu0 %v2350_v7  ;;  %v2374_v43 = vpack.c.bf16 %v645_v42, %v644_v41  ;;  %v2378_v46 = vpack.c.bf16 %v647_v45, %v646_v44  ;;  %v777_v47 = vld [vmem:[%s3139_s7] sm:$0xff]  ;;  %v779_v49 = vld [vmem:[%s3139_s7 + $0x10] sm:$0xff]  ;;  %v780_v51 = vld [vmem:[%s3139_s7 + $0x18] sm:$0xff] }
  0x17   : > { %s2103_s29 = sshll.u32 %s3157_s16, 4  ;;  %2355 = vmatprep.subr.bf16.mxu0 %v2354_v14  ;;  %v2382_v50 = vpack.c.bf16 %v778_v48, %v777_v47  ;;  %v2386_v52 = vpack.c.bf16 %v780_v51, %v779_v49  ;;  %v781_v53 = vld [vmem:[%s3139_s7 + $0x20] sm:$0xff]  ;;  %v782_v54 = vld [vmem:[%s3139_s7 + $0x28] sm:$0xff]  ;;  %v783_v56 = vld [vmem:[%s3139_s7 + $0x30] sm:$0xff]  ;;  %s1967_s16 = sshll.u32 %s2856_s12, 4  ;;  %s3083_s16 = int_to_ptr.vmem [resolvable:$true] %s1967_s16 }
  0x18   : > { %s388_s13 = scalar_lea.vmem %s3132_s0, %s2103_s29  ;;  %2365 = vmatpush1.bf16.msra.mxu1 %v2364_v24  ;;  %v2390_v55 = vpack.c.bf16 %v782_v54, %v781_v53  ;;  %v784_v57 = vld [vmem:[%s3139_s7 + $0x38] sm:$0xff]  ;;  %v785_v61 = vld [vmem:[%s3139_s7 + $0x40] sm:$0xff]  ;;  %v786_v62 = vld [vmem:[%s3139_s7 + $0x48] sm:$0xff]  ;;  %s2614_s29 = scalar_lea.vmem %s3083_s16, 512 }
  0x19   : > { %v391_v15 = vld [vmem:[%s388_s13] sm:$0xff]  ;;  %v392_v16 = vld [vmem:[%s388_s13 + $0x8] sm:$0xff]  ;;  %v393_v17 = vld [vmem:[%s388_s13 + $0x10] sm:$0xff]  ;;  %2367 = vmatprep.subr.bf16.mxu1 %v2366_v28  ;;  %v2394_v58 = vpack.c.bf16 %v784_v57, %v783_v56  ;;  %v2398_v63 = vpack.c.bf16 %v786_v62, %v785_v61  ;;  %p2615_p11 = scmp.ne.s32.totalorder %s3083_s16, %s2614_s29 }
  0x1a   : > { %2204 = vmatprep.mubr.msk.f32.mxu0 %vm408_vm0, %v391_v15  ;;  %2357 = vmatpush3.bf16.msra.mxu0 %v2354_v14  ;;  %v394_v18 = vld [vmem:[%s388_s13 + $0x18] sm:$0xff]  ;;  %v519_v1 = vld [vmem:[%s3136_s4] sm:$0x3]  ;;  %v787_v3 = vld [vmem:[%s3139_s7 + $0x50] sm:$0xff]  ;;  %s2618_s13 = sshll.u32 %s2681_s30, 4  ;;  %s2619_s13 = int_to_ptr.vmem [resolvable:$false] %s2618_s13 }
  0x1b   : > { %2383 = vmatprep.subr.bf16.mxu0 %v2382_v50  ;;  %v788_v4 = vld [vmem:[%s3139_s7 + $0x58] sm:$0xff]  ;;  %v524_v6 = vrot.slane %v519_v1, %v523_v0  ;;  %v528_v7 = vrot.slane %v519_v1, %v527_v2  ;;  %vm2986_vm4 = vmpackc.low %vm506_vm1, %vm506_vm1  ;;  %p2616_p12 = pnand %p2615_p11, %p2782_p5  ;;  %p2621_p0 = scmp.lt.s32.totalorder %s3083_s16, %s2619_s13 }
  0x1c   : > { %v2402_v5 = vpack.c.bf16 %v788_v4, %v787_v3 }
  0x1d   : > { %2205 = vmatmul.mubr.msk.f32.vlgmr.msra.gmra.mrb[0].mxu0 %vm408_vm0, %v392_v16  ;;  %p2617_p13 = pneg %p2616_p12 }
  0x1e   : > { %2207 = vmatprep.mubr.msk.f32.mxu0 %vm408_vm0, %v393_v17  ;;  %2385 = vmatpush3.bf16.msra.mxu0 %v2382_v50  ;;  %v2046_v50 = vld [vmem:[%s3138_s6] ss:$0 sm:$0xff] }
  0x1f   : > { %2387 = vmatprep.subr.bf16.mxu0 %v2386_v52 }
  0x21   : > { %2208 = vmatmul.mubr.msk.f32.gmra.mrb[2].mxu0 %vm408_vm0, %v394_v18 }
  0x22   : > { %2389 = vmatpush3.bf16.msra.mxu0 %v2386_v52 }
  0x23   : > { %2391 = vmatprep.subr.bf16.mxu0 %v2390_v55 }
  0x26   : > { %2393 = vmatpush3.bf16.msra.mxu0 %v2390_v55 }
  0x27   : > { %2395 = vmatprep.subr.bf16.mxu0 %v2394_v58 }
  0x2a   : > { %2397 = vmatpush3.bf16.msra.mxu0 %v2394_v58 }
  0x2b   : > { %2399 = vmatprep.subr.bf16.mxu0 %v2398_v63 }
  0x2e   : > { %2401 = vmatpush3.bf16.msra.mxu0 %v2398_v63 }
  0x2f   : > { %2403 = vmatprep.subr.bf16.mxu0 %v2402_v5 }
  0x32   : > { %2405 = vmatpush3.bf16.msra.mxu0 %v2402_v5 }
  0xf0   : > { %v2206_v32 = vpop.f32.mrb[0].mxu0 }
  0xf1   : > { %v493_v33 = vadd.f32 %v2206_v32, %v2037_v29  ;;  %v487_v34 = vpop.f32.mrb[1].mxu0  ;;  %v938_v32 = vld [vmem:[%s3141_s9] sm:$0xff] }
  0xf2   : > { %v488_v35 = vadd.f32 %v2037_v29, %v487_v34 }
  0xf3   : > { %508 = vst.msk [vmem:[%s2856_s12 + $0x8] sm:$0xff] %vm506_vm1, %v493_v33 }
  0xf4   : > { %507 = vst.msk [vmem:[%s2856_s12] sm:$0xff] %vm506_vm1, %v488_v35  ;;  %2042 = vmatmul.mubr.msk.f32.vlgmr.msra.gmra.mrb[0].mxu1 %vm506_vm1, %v488_v35  ;;  %v2209_v37 = vpop.f32.mrb[2].mxu0  ;;  %v940_v35 = vld [vmem:[%s3141_s9 + $0x10] sm:$0xff] }
  0xf5   : > { %613 = vmatprep.mubr.f32.mxu1 %v2678_v25  ;;  %v503_v38 = vadd.f32 %v2209_v37, %v2037_v29  ;;  %v497_v39 = vpop.f32.mrb[3].mxu0  ;;  %2369 = vmatpush3.bf16.msra.mxu1 %v2366_v28 }
  0xf6   : > { %v498_v40 = vadd.f32 %v2037_v29, %v497_v39  ;;  %2371 = vmatprep.subr.bf16.mxu1 %v2370_v36 }
  0xf7   : > { %510 = vst.msk [vmem:[%s2856_s12 + $0x18] sm:$0xff] %vm506_vm1, %v503_v38 }
  0xf8   : > { %2043 = vmatmul.mubr.msk.f32.gmra.mrb[2].mxu1 %vm506_vm1, %v493_v33  ;;  %509 = vst.msk [vmem:[%s2856_s12 + $0x10] sm:$0xff] %vm506_vm1, %v498_v40  ;;  %v939_v33 = vld [vmem:[%s3141_s9 + $0x8] sm:$0xff] }
  0xf9   : > { %619 = vmatprep.mubr.f32.mxu1 %v2678_v25  ;;  %2373 = vmatpush3.bf16.msra.mxu1 %v2370_v36  ;;  %v2406_v34 = vpack.c.bf16 %v939_v33, %v938_v32  ;;  %v941_v36 = vld [vmem:[%s3141_s9 + $0x18] sm:$0xff] }
  0xfa   : > { %2375 = vmatprep.subr.bf16.mxu1 %v2374_v43  ;;  %v2410_v37 = vpack.c.bf16 %v941_v36, %v940_v35  ;;  %v2064_v36 = vld [vmem:[%s3142_s10] ss:$0 sm:$0xff] }
  0xfc   : > { %2044 = vmatmul.mubr.msk.f32.gmra.mrb[4].mxu1 %vm506_vm1, %v498_v40 }
  0xfd   : > { %625 = vmatprep.mubr.f32.mxu1 %v2678_v25  ;;  %2377 = vmatpush3.bf16.msra.mxu1 %v2374_v43 }
  0xfe   : > { %2379 = vmatprep.subr.bf16.mxu1 %v2378_v46 }
 0x100   : > { %2045 = vmatmul.mubr.msk.f32.gmra.mrb[6].mxu1 %vm506_vm1, %v503_v38 }
 0x101   : > { %2381 = vmatpush3.bf16.msra.mxu1 %v2378_v46 }
 0x102   : > { %2407 = vmatprep.subr.bf16.mxu1 %v2406_v34 }
 0x1c7   : > { %v609_v8 = vpop.f32.mrb[0].mxu1 }
 0x1c8   : > { %v610_v9 = vadd.f32 %v609_v8, %v524_v6  ;;  %v611_v10 = vpop.f32.mrb[1].mxu1 }
 0x1c9   : > { %v612_v12 = vadd.f32 %v611_v10, %v528_v7 }
 0x1ca   : > { %v632_v11 = vmax.f32 %v610_v9, 0.0 }
 0x1cb   : > { %v615_v13 = vpop.f32.mrb[2].mxu1  ;;  %v633_v16 = vmax.f32 %v612_v12, 0.0 }
 0x1cc   : > { %v616_v14 = vadd.f32 %v615_v13, %v524_v6  ;;  %v617_v15 = vpop.f32.mrb[3].mxu1  ;;  %800 = vrot.lane.b32.xlu0 %v632_v11, %s2679_s24  ;;  %2226 = vmatprep.mubr.msk.f32.mxu1 %vm655_vm2, %v632_v11  ;;  %v2055_v11 = vld [vmem:[%s3140_s8] ss:$0 sm:$0xff] }
 0x1cd   : > { %v618_v18 = vadd.f32 %v617_v15, %v528_v7 }
 0x1ce   : > { %v634_v17 = vmax.f32 %v616_v14, 0.0 }
 0x1cf   : > { %v621_v19 = vpop.f32.mrb[4].mxu1  ;;  %v635_v23 = vmax.f32 %v618_v18, 0.0 }
 0x1d0   : > { %804 = vrot.lane.b32.xlu1 %v634_v17, %s2679_s24  ;;  %802 = vrot.lane.b32.xlu0 %v633_v16, %s2679_s24  ;;  %v622_v20 = vadd.f32 %v621_v19, %v524_v6  ;;  %v623_v21 = vpop.f32.mrb[5].mxu1 }
 0x1d1   : > { %2227 = vmatmul.mubr.msk.f32.vlgmr.msra.gmra.mrb[8].mxu1 %vm655_vm2, %v634_v17  ;;  %v624_v22 = vadd.f32 %v623_v21, %v528_v7 }
 0x1d2   : > { %v636_v24 = vmax.f32 %v622_v20, 0.0  ;;  %2409 = vmatpush3.bf16.msra.mxu1 %v2406_v34 }
 0x1d3   : > { %v627_v25 = vpop.f32.mrb[6].mxu1  ;;  %v637_v26 = vmax.f32 %v624_v22, 0.0  ;;  %2411 = vmatprep.subr.bf16.mxu1 %v2410_v37 }
 0x1d4   : > { %v628_v27 = vadd.f32 %v627_v25, %v524_v6  ;;  %806 = vrot.lane.b32.xlu1 %v635_v23, %s2679_s24  ;;  %v629_v28 = vpop.f32.mrb[7].mxu1  ;;  %808 = vrot.lane.b32.xlu0 %v636_v24, %s2679_s24 }
 0x1d5   : > { %2229 = vmatprep.mubr.msk.f32.mxu1 %vm655_vm2, %v636_v24  ;;  %v630_v30 = vadd.f32 %v629_v28, %v528_v7 }
 0x1d6   : > { %v638_v29 = vmax.f32 %v628_v27, 0.0  ;;  %2413 = vmatpush3.bf16.msra.mxu1 %v2410_v37 }
 0x1d7   : > { %v639_v31 = vmax.f32 %v630_v30, 0.0  ;;  %2415 = vmatprep.subr.bf16.mxu1 %v2406_v34 }
 0x1d8   : > { %810 = vrot.lane.b32.xlu1 %v637_v26, %s2679_s24  ;;  %2230 = vmatmul.mubr.msk.f32.gmra.mrb[10].mxu1 %vm655_vm2, %v638_v29 }
 0x1d9   : > { %812 = vrot.lane.b32.xlu0 %v638_v29, %s2679_s24 }
 0x1dc   : > { %814 = vrot.lane.b32.xlu1 %v639_v31, %s2679_s24 }
 0x23e   : > { %v801_v38 = vpop.permute.xlu0 %800 }
 0x242   : > { %v805_v39 = vpop.permute.xlu1 %804  ;;  %v803_v40 = vpop.permute.xlu0 %802 }
 0x243   : > { %v816_v41 = vsel %vm655_vm2, %v801_v38, %v803_v40 }
 0x244   : > { %2256 = vmatprep.mubr.msk.f32.mxu0 %vm820_vm3, %v816_v41 }
 0x246   : > { %v807_v42 = vpop.permute.xlu1 %806  ;;  %v809_v44 = vpop.permute.xlu0 %808 }
 0x247   : > { %v817_v43 = vsel %vm655_vm2, %v805_v39, %v807_v42 }
 0x248   : > { %2257 = vmatmul.mubr.msk.f32.vlgmr.msra.gmra.mrb[4].mxu0 %vm820_vm3, %v817_v43 }
 0x24a   : > { %v811_v45 = vpop.permute.xlu1 %810 }
 0x24b   : > { %v818_v46 = vsel %vm655_vm2, %v809_v44, %v811_v45  ;;  %v813_v47 = vpop.permute.xlu0 %812 }
 0x24c   : > { %2259 = vmatprep.mubr.msk.f32.mxu0 %vm820_vm3, %v818_v46 }
 0x24e   : > { %v815_v48 = vpop.permute.xlu1 %814 }
 0x24f   : > { %v819_v49 = vsel %vm655_vm2, %v813_v47, %v815_v48 }
 0x250   : > { %2260 = vmatmul.mubr.msk.f32.gmra.mrb[6].mxu0 %vm820_vm3, %v819_v49 }
 0x2a4   : > { %v2228_v51 = vpop.f32.mrb[8].mxu1 }
 0x2a5   : > { %v740_v52 = vadd.f32 %v2228_v51, %v2046_v50  ;;  %v734_v53 = vpop.f32.mrb[9].mxu1 }
 0x2a6   : > { %v735_v54 = vadd.f32 %v2046_v50, %v734_v53 }
 0x2a7   : > { %v2052_v55 = vmul.f32 -1.442695, %v740_v52 }
 0x2a8   : > { %v2051_v56 = vmul.f32 -1.442695, %v735_v54 }
 0x2a9   : > { %2550 = vpow2.f32 %v2052_v55 }
 0x2aa   : > { %2552 = vpow2.f32 %v2051_v56 }
 0x2ab   : > { %v2231_v57 = vpop.f32.mrb[10].mxu1 }
 0x2ac   : > { %v750_v58 = vadd.f32 %v2231_v57, %v2046_v50  ;;  %v744_v59 = vpop.f32.mrb[11].mxu1 }
 0x2ad   : > { %v745_v60 = vadd.f32 %v2046_v50, %v744_v59 }
 0x2ae   : > { %v2054_v61 = vmul.f32 -1.442695, %v750_v58 }
 0x2af   : > { %v2053_v62 = vmul.f32 -1.442695, %v745_v60 }
 0x2b0   : > { %2554 = vpow2.f32 %v2054_v61 }
 0x2b1   : > { %2556 = vpow2.f32 %v2053_v62 }
 0x2b3   : > { %v2551_v63 = vpop.eup %2550 }
 0x2b4   : > { %v2553_v0 = vpop.eup %2552  ;;  %v766_v1 = vadd.f32 1.0, %v2551_v63 }
 0x2b5   : > { %v765_v2 = vadd.f32 1.0, %v2553_v0 }
 0x2b7   : > { %2558 = vrcp.f32 %v765_v2 }
 0x2b8   : > { %2560 = vrcp.f32 %v766_v1 }
 0x2ba   : > { %v2555_v3 = vpop.eup %2554 }
 0x2bb   : > { %v2557_v4 = vpop.eup %2556  ;;  %v768_v5 = vadd.f32 1.0, %v2555_v3 }
 0x2bc   : > { %v767_v6 = vadd.f32 1.0, %v2557_v4 }
 0x2bd   : > { %2562 = vrcp.f32 %v768_v5 }
 0x2be   : > { %2564 = vrcp.f32 %v767_v6 }
 0x2c1   : > { %v2559_v7 = vpop.eup %2558 }
 0x2c2   : > { %v2561_v8 = vpop.eup %2560  ;;  %2270 = vmatprep.mubr.msk.f32.mxu1 %vm506_vm1, %v2559_v7 }
 0x2c3   : > { %2271 = vmatmul.mubr.msk.f32.vlgmr.msra.gmra.mrb[12].mxu1 %vm506_vm1, %v2561_v8 }
 0x2c4   : > { %2417 = vmatpush3.bf16.msra.mxu1 %v2406_v34 }
 0x2c5   : > { %2419 = vmatprep.subr.bf16.mxu1 %v2410_v37 }
 0x2c7   : > { %v2563_v9 = vpop.eup %2562 }
 0x2c8   : > { %v2565_v10 = vpop.eup %2564  ;;  %2421 = vmatpush3.bf16.msra.mxu1 %v2410_v37 }
 0x2c9   : > { %2273 = vmatprep.mubr.msk.f32.mxu1 %vm506_vm1, %v2565_v10 }
 0x2ca   : > { %2274 = vmatmul.mubr.msk.f32.gmra.mrb[14].mxu1 %vm506_vm1, %v2563_v9 }
 0x31b   : > { %v2258_v12 = vpop.f32.mrb[4].mxu0 }
 0x31c   : > { %v901_v13 = vadd.f32 %v2258_v12, %v2055_v11  ;;  %v895_v14 = vpop.f32.mrb[5].mxu0 }
 0x31d   : > { %v896_v15 = vadd.f32 %v2055_v11, %v895_v14 }
 0x31e   : > { %v2061_v16 = vmul.f32 -1.442695, %v901_v13 }
 0x31f   : > { %v2060_v17 = vmul.f32 -1.442695, %v896_v15 }
 0x320   : > { %2566 = vpow2.f32 %v2061_v16 }
 0x321   : > { %2568 = vpow2.f32 %v2060_v17 }
 0x323   : > { %v2261_v18 = vpop.f32.mrb[6].mxu0 }
 0x324   : > { %v911_v19 = vadd.f32 %v2261_v18, %v2055_v11  ;;  %v905_v20 = vpop.f32.mrb[7].mxu0 }
 0x325   : > { %v906_v21 = vadd.f32 %v2055_v11, %v905_v20 }
 0x326   : > { %v2063_v22 = vmul.f32 -1.442695, %v911_v19 }
 0x327   : > { %v2062_v23 = vmul.f32 -1.442695, %v906_v21 }
 0x328   : > { %2570 = vpow2.f32 %v2063_v22 }
 0x329   : > { %2572 = vpow2.f32 %v2062_v23 }
 0x32a   : > { %v2567_v24 = vpop.eup %2566 }
 0x32b   : > { %v2569_v25 = vpop.eup %2568  ;;  %v927_v26 = vadd.f32 1.0, %v2567_v24 }
 0x32c   : > { %v926_v27 = vadd.f32 1.0, %v2569_v25 }
 0x32e   : > { %2574 = vrcp.f32 %v926_v27 }
 0x32f   : > { %2576 = vrcp.f32 %v927_v26 }
 0x332   : > { %v2571_v28 = vpop.eup %2570 }
 0x333   : > { %v2573_v29 = vpop.eup %2572  ;;  %v929_v30 = vadd.f32 1.0, %v2571_v28 }
 0x334   : > { %v928_v31 = vadd.f32 1.0, %v2573_v29 }
 0x336   : > { %2578 = vrcp.f32 %v928_v31 }
 0x337   : > { %2580 = vrcp.f32 %v929_v30 }
 0x338   : > { %v2575_v32 = vpop.eup %2574 }
 0x339   : > { %v2577_v33 = vpop.eup %2576  ;;  %2284 = vmatprep.mubr.msk.f32.mxu1 %vm506_vm1, %v2575_v32 }
 0x33a   : > { %2285 = vmatmul.mubr.msk.f32.vlgmr.msra.gmra.mrb[16].mxu1 %vm506_vm1, %v2577_v33 }
 0x340   : > { %v2579_v34 = vpop.eup %2578 }
 0x341   : > { %v2581_v35 = vpop.eup %2580  ;;  %2287 = vmatprep.mubr.msk.f32.mxu1 %vm506_vm1, %v2579_v34 }
 0x342   : > { %2288 = vmatmul.mubr.msk.f32.gmra.mrb[18].mxu1 %vm506_vm1, %v2581_v35 }
 0x396   : > { %v2272_v37 = vpop.f32.mrb[12].mxu1 }
 0x397   : > { %v1027_v38 = vpop.f32.mrb[13].mxu1  ;;  %v1033_v46 = vadd.f32 %v2272_v37, %v2064_v36 }
 0x398   : > { %v1028_v39 = vadd.f32 %v2064_v36, %v1027_v38 }
 0x39a   : > { %2294 = vmatprep.mubr.msk.f32.mxu1 %vm506_vm1, %v1028_v39  ;;  %v2975_v49 = vpack.i.bf16 %v1033_v46, %v1028_v39 }
 0x39d   : > { %v2275_v40 = vpop.f32.mrb[14].mxu1 }
 0x39e   : > { %v1037_v41 = vpop.f32.mrb[15].mxu1  ;;  %v1043_v53 = vadd.f32 %v2275_v40, %v2064_v36 }
 0x39f   : > { %v1038_v54 = vadd.f32 %v2064_v36, %v1037_v41 }
 0x3a1   : > { %v2981_v56 = vpack.i.bf16 %v1043_v53, %v1038_v54 }
 0x40d   : > { %v2286_v42 = vpop.f32.mrb[16].mxu1 }
 0x40e   : > { %v1130_v43 = vadd.f32 %v2286_v42, %v2064_v36  ;;  %v1124_v44 = vpop.f32.mrb[17].mxu1 }
 0x40f   : > { %v1125_v45 = vadd.f32 %v2064_v36, %v1124_v44 }
 0x411   : > { %2308 = vmatprep.mubr.msk.f32.mxu0 %vm506_vm1, %v1125_v45  ;;  %v2972_v47 = vpack.i.bf16 %v1130_v43, %v1125_v45 }
 0x413   : > { %2511 = vrot.lane.b32.xlu0 %v2972_v47, %s2680_s14 }
 0x415   : > { %v2289_v48 = vpop.f32.mrb[18].mxu1 }
 0x416   : > { %v1140_v50 = vadd.f32 %v2289_v48, %v2064_v36  ;;  %v1134_v51 = vpop.f32.mrb[19].mxu1 }
 0x417   : > { %v1135_v52 = vadd.f32 %v2064_v36, %v1134_v51  ;;  %2521 = vrot.lane.b32.xlu0 %v2975_v49, %s2680_s14 }
 0x419   : > { %v2978_v55 = vpack.i.bf16 %v1140_v50, %v1135_v52 }
 0x41b   : > { %2516 = vrot.lane.b32.xlu1 %v2978_v55, %s2680_s14 }
 0x41f   : > { %2526 = vrot.lane.b32.xlu1 %v2981_v56, %s2680_s14  ;;  %s2620_s14 = scalar_lea.vmem %s2619_s13, 1024 }
 0x420   : > { %p2622_p1 = scmp.lt.s32.totalorder %s2620_s14, %s2614_s29 }
 0x422   : > { %p2623_p2 = por %p2622_p1, %p2621_p0 }
 0x424   : > { %p2624_p3 = pnand %p2623_p2, %p2617_p13 }
 0x485   : > { %v2512_v57 = vpop.permute.xlu0 %2511 }
 0x486   : > { %v2514_v58 = vunpack.i.h.bf16 %v2512_v57  ;;  %v2513_v59 = vunpack.i.l.bf16 %v2512_v57 }
 0x488   : > { %v2422_v61 = vpack.c.bf16 %v2514_v58, %v2513_v59 }
 0x489   : > { %v2522_v62 = vpop.permute.xlu0 %2521 }
 0x48a   : > { %v2524_v63 = vunpack.i.h.bf16 %v2522_v62  ;;  %v2523_v0 = vunpack.i.l.bf16 %v2522_v62  ;;  %2424 = vmatprep.subr.msk.bf16.mxu1 %vm2986_vm4, %v2422_v61 }
 0x48b   : > { %2427 = vmatpush3.bf16.xpose.msk.msra.mxu1 %vm2986_vm4, %v2422_v61 }
 0x48c   : > { %v2434_v1 = vpack.c.bf16 %v2524_v63, %v2523_v0 }
 0x48d   : > { %v2517_v2 = vpop.permute.xlu1 %2516 }
 0x48e   : > { %v2519_v3 = vunpack.i.h.bf16 %v2517_v2  ;;  %v2518_v4 = vunpack.i.l.bf16 %v2517_v2  ;;  %2436 = vmatprep.subr.msk.bf16.mxu0 %vm2986_vm4, %v2434_v1 }
 0x48f   : > { %2439 = vmatpush3.bf16.xpose.msk.msra.mxu0 %vm2986_vm4, %v2434_v1 }
 0x490   : > { %v2428_v5 = vpack.c.bf16 %v2519_v3, %v2518_v4 }
 0x491   : > { %v2527_v6 = vpop.permute.xlu1 %2526 }
 0x492   : > { %v2529_v7 = vunpack.i.h.bf16 %v2527_v6  ;;  %v2528_v8 = vunpack.i.l.bf16 %v2527_v6  ;;  %2295 = vmatmul.mubr.msk.f32.vlgmr.msra.gmra.mrb[20].mxu1 %vm506_vm1, %v1033_v46  ;;  %2430 = vmatprep.subr.msk.bf16.mxu1 %vm2986_vm4, %v2428_v5 }
 0x493   : > { %2433 = vmatpush3.bf16.xpose.msk.msra.mxu1 %vm2986_vm4, %v2428_v5  ;;  %2301 = vmatprep.mubr.msk.f32.mxu1 %vm506_vm1, %v1038_v54 }
 0x494   : > { %v2440_v9 = vpack.c.bf16 %v2529_v7, %v2528_v8 }
 0x496   : > { %2309 = vmatmul.mubr.msk.f32.vlgmr.msra.gmra.mrb[8].mxu0 %vm506_vm1, %v1130_v43  ;;  %2442 = vmatprep.subr.msk.bf16.mxu1 %vm2986_vm4, %v2440_v9 }
 0x49a   : > { %2302 = vmatmul.mubr.msk.f32.vlgmr.msra.gmra.mrb[22].mxu1 %vm506_vm1, %v1043_v53 }
 0x49b   : > { %2445 = vmatpush3.bf16.xpose.msk.msra.mxu1 %vm2986_vm4, %v2440_v9  ;;  %2315 = vmatprep.mubr.msk.f32.mxu1 %vm506_vm1, %v1135_v52 }
 0x4a2   : > { %2316 = vmatmul.mubr.msk.f32.vlgmr.msra.gmra.mrb[24].mxu1 %vm506_vm1, %v1140_v50 }
 0x565   : > { %v3012_v10 = vpop.f32.mrb[20].mxu1 }
 0x566   : > { %v1225_v11 = vpop.f32.mrb[21].mxu1  ;;  %v1329_v24 = vsel %vm1325_vm5, %v3012_v10, -inf }
 0x567   : > { %v1326_v18 = vsel %vm1325_vm5, %v1225_v11, -inf }
 0x569   : > { %v2310_v12 = vpop.f32.mrb[8].mxu0 }
 0x56a   : > { %v1448_v13 = vpop.f32.mrb[9].mxu0  ;;  %v1547_v14 = vsel %vm1325_vm5, %v2310_v12, -inf }
 0x56b   : > { %1548 = vmax.xlane.f32.xlu1 %v1547_v14  ;;  %v1544_v15 = vsel %vm1325_vm5, %v1448_v13, -inf }
 0x56c   : > { %1545 = vmax.xlane.f32.xlu0 %v1544_v15 }
 0x56d   : > { %v2303_v16 = vpop.f32.mrb[22].mxu1 }
 0x56e   : > { %v1316_v17 = vpop.f32.mrb[23].mxu1  ;;  %v1335_v25 = vsel %vm1325_vm5, %v2303_v16, -inf }
 0x56f   : > { %1327 = vmax.xlane.f32.xlu1 %v1326_v18  ;;  %v1332_v19 = vsel %vm1325_vm5, %v1316_v17, -inf }
 0x573   : > { %1333 = vmax.xlane.f32.xlu1 %v1332_v19 }
 0x575   : > { %v2317_v20 = vpop.f32.mrb[24].mxu1 }
 0x576   : > { %v3018_v21 = vpop.f32.mrb[25].mxu1  ;;  %v1553_v23 = vsel %vm1325_vm5, %v2317_v20, -inf }
 0x577   : > { %v1550_v22 = vsel %vm1325_vm5, %v3018_v21, -inf }
 0x578   : > { %1551 = vmax.xlane.f32.xlu0 %v1550_v22 }
 0x57c   : > { %1554 = vmax.xlane.f32.xlu0 %v1553_v23 }
 0x580   : > { %1330 = vmax.xlane.f32.xlu0 %v1329_v24 }
 0x584   : > { %1336 = vmax.xlane.f32.xlu0 %v1335_v25  ;;  %2531 = vrot.lane.b32.xlu1 %v2975_v49, %s2679_s24 }
 0x5f8   : > { %v1549_v26 = vpop.xlane.xlu1 %1548 }
 0x5f9   : > { %v1557_v27 = vsub.f32 %v2310_v12, %v1549_v26  ;;  %v1546_v28 = vpop.xlane.xlu0 %1545 }
 0x5fa   : > { %v1556_v29 = vsub.f32 %v1448_v13, %v1546_v28 }
 0x5fb   : > { %v1562_v30 = vmul.f32 1.442695, %v1557_v27 }
 0x5fc   : > { %v1560_v31 = vmul.f32 1.442695, %v1556_v29  ;;  %v1328_v32 = vpop.xlane.xlu1 %1327 }
 0x5fd   : > { %2582 = vpow2.f32 %v1562_v30  ;;  %v1338_v33 = vsub.f32 %v1225_v11, %v1328_v32 }
 0x5fe   : > { %2584 = vpow2.f32 %v1560_v31 }
 0x5ff   : > { %v1342_v34 = vmul.f32 1.442695, %v1338_v33 }
 0x600   : > { %v1334_v35 = vpop.xlane.xlu1 %1333 }
 0x601   : > { %2586 = vpow2.f32 %v1342_v34  ;;  %v1340_v36 = vsub.f32 %v1316_v17, %v1334_v35 }
 0x603   : > { %v1346_v37 = vmul.f32 1.442695, %v1340_v36 }
 0x604   : > { %v2532_v38 = vpop.permute.xlu1 %2531 }
 0x605   : > { %2588 = vpow2.f32 %v1346_v37  ;;  %v2534_v39 = vunpack.i.h.bf16 %v2532_v38  ;;  %v2533_v40 = vunpack.i.l.bf16 %v2532_v38  ;;  %v1552_v41 = vpop.xlane.xlu0 %1551 }
 0x606   : > { %v1558_v5 = vsub.f32 %v3018_v21, %v1552_v41 }
 0x607   : > { %v2583_v42 = vpop.eup %2582  ;;  %v2446_v43 = vpack.c.bf16 %v2534_v39, %v2533_v40 }
 0x608   : > { %v2585_v44 = vpop.eup %2584  ;;  %v1571_v45 = vsel %vm1325_vm5, %v2583_v42, 0.0  ;;  %v1564_v6 = vmul.f32 1.442695, %v1558_v5 }
 0x609   : > { %1572 = vadd.xlane.f32.xlu0 %v1571_v45  ;;  %v1555_v46 = vpop.xlane.xlu0 %1554  ;;  %2447 = vmatprep.subr.bf16.mxu0 %v2446_v43  ;;  %v1568_v48 = vsel %vm1325_vm5, %v2585_v44, 0.0  ;;  %v1941_v45 = vld [vmem:[%s2856_s12 + $0x8] sm:$0xff] }
 0x60a   : > { %1569 = vadd.xlane.f32.xlu1 %v1568_v48  ;;  %2449 = vmatpush3.bf16.msra.mxu0 %v2446_v43  ;;  %v1559_v54 = vsub.f32 %v2317_v20, %v1555_v46 }
 0x60b   : > { %v3030_v49 = vpop.eup %2586 }
 0x60c   : > { %v1350_v50 = vsel %vm1325_vm5, %v3030_v49, 0.0  ;;  %v1566_v61 = vmul.f32 1.442695, %v1559_v54  ;;  %v1943_v54 = vld [vmem:[%s2856_s12 + $0x18] sm:$0xff] }
 0x60d   : > { %v1331_v51 = vpop.xlane.xlu0 %1330 }
 0x60e   : > { %v1339_v52 = vsub.f32 %v3012_v10, %v1331_v51  ;;  %1351 = vadd.xlane.f32.xlu1 %v1350_v50 }
 0x60f   : > { %v3035_v53 = vpop.eup %2588 }
 0x610   : > { %v1344_v57 = vmul.f32 1.442695, %v1339_v52  ;;  %v1356_v58 = vsel %vm1325_vm5, %v3035_v53, 0.0 }
 0x611   : > { %v1337_v59 = vpop.xlane.xlu0 %1336 }
 0x612   : > { %2590 = vpow2.f32 %v1344_v57  ;;  %v1341_v60 = vsub.f32 %v2303_v16, %v1337_v59  ;;  %1357 = vadd.xlane.f32.xlu1 %v1356_v58  ;;  %v1942_v59 = vld [vmem:[%s2856_s12 + $0x10] sm:$0xff] }
 0x614   : > { %v1348_v62 = vmul.f32 1.442695, %v1341_v60 }
 0x616   : > { %2592 = vpow2.f32 %v1348_v62 }
 0x617   : > { %2594 = vpow2.f32 %v1566_v61 }
 0x618   : > { %2596 = vpow2.f32 %v1564_v6 }
 0x61c   : > { %v3039_v63 = vpop.eup %2590 }
 0x61d   : > { %v1353_v0 = vsel %vm1325_vm5, %v3039_v63, 0.0 }
 0x61e   : > { %1354 = vadd.xlane.f32.xlu0 %v1353_v0 }
 0x620   : > { %v3043_v1 = vpop.eup %2592 }
 0x621   : > { %v1359_v2 = vsel %vm1325_vm5, %v3043_v1, 0.0  ;;  %v2595_v3 = vpop.eup %2594 }
 0x622   : > { %1360 = vadd.xlane.f32.xlu0 %v1359_v2  ;;  %v1577_v4 = vsel %vm1325_vm5, %v2595_v3, 0.0  ;;  %v2597_v7 = vpop.eup %2596 }
 0x623   : > { %2541 = vrot.lane.b32.xlu1 %v2972_v47, %s2679_s24  ;;  %v1574_v8 = vsel %vm1325_vm5, %v2597_v7, 0.0 }
 0x626   : > { %1578 = vadd.xlane.f32.xlu0 %v1577_v4 }
 0x63c   : > { %2536 = vrot.lane.b32.xlu0 %v2981_v56, %s2679_s24 }
 0x647   : > { %1575 = vadd.xlane.f32.xlu1 %v1574_v8 }
 0x658   : > { %2546 = vrot.lane.b32.xlu1 %v2978_v55, %s2679_s24  ;;  %s2105_s24 = sshll.u32 %s2765_s21, 9  ;;  %s3150_s21 = sand.u32 1, %s2668_s18  }
 0x659   : > { %s3081_s26 = scalar_lea.hbm %s3143_s11, %s2105_s24  ;;  %s3091_s25 = scalar_lea.sflag [#allocation3], %s3150_s21 }
 0x696   : > { %v1573_v9 = vpop.xlane.xlu0 %1572 }
 0x697   : > { %2598 = vrcp.f32 %v1573_v9  ;;  %v1570_v47 = vpop.xlane.xlu1 %1569 }
 0x698   : > { %2600 = vrcp.f32 %v1570_v47 }
 0x69b   : > { %v1352_v56 = vpop.xlane.xlu1 %1351 }
 0x69c   : > { %2602 = vrcp.f32 %v1352_v56 }
 0x69f   : > { %v1358_v15 = vpop.xlane.xlu1 %1357 }
 0x6a1   : > { %v2599_v10 = vpop.eup %2598 }
 0x6a2   : > { %v2601_v11 = vpop.eup %2600  ;;  %v1583_v13 = vmul.f32 %v2599_v10, %v2583_v42 }
 0x6a3   : > { %v1581_v12 = vmul.f32 %v2601_v11, %v2585_v44  ;;  %v2542_v18 = vpop.permute.xlu1 %2541 }
 0x6a4   : > { %v2544_v55 = vunpack.i.h.bf16 %v2542_v18  ;;  %v2543_v20 = vunpack.i.l.bf16 %v2542_v18 }
 0x6a5   : > { %2322 = vmatprep.mubr.msk.f32.mxu0 %vm1325_vm5, %v1581_v12 }
 0x6a6   : > { %2323 = vmatmul.mubr.msk.f32.vlgmr.msra.gmra.mrb[10].mxu0 %vm1325_vm5, %v1583_v13  ;;  %v2454_v24 = vpack.c.bf16 %v2544_v55, %v2543_v20  ;;  %v2603_v27 = vpop.eup %2602 }
 0x6a7   : > { %v1363_v35 = vmul.f32 %v2603_v27, %v3030_v49  ;;  %v1940_v49 = vld [vmem:[%s2856_s12] sm:$0xff] }
 0x6ab   : > { %v1355_v14 = vpop.xlane.xlu0 %1354 }
 0x6af   : > { %v1361_v16 = vpop.xlane.xlu0 %1360 }
 0x6b3   : > { %v1579_v17 = vpop.xlane.xlu0 %1578 }
 0x6b4   : > { %2604 = vrcp.f32 %v1579_v17 }
 0x6b7   : > { %v2537_v19 = vpop.permute.xlu0 %2536 }
 0x6b8   : > { %v2539_v21 = vunpack.i.h.bf16 %v2537_v19  ;;  %v2538_v22 = vunpack.i.l.bf16 %v2537_v19 }
 0x6ba   : > { %v2450_v23 = vpack.c.bf16 %v2539_v21, %v2538_v22 }
 0x6bc   : > { %2451 = vmatprep.subr.bf16.mxu0 %v2450_v23 }
 0x6bd   : > { %2453 = vmatpush3.bf16.msra.mxu0 %v2450_v23 }
 0x6be   : > { %2455 = vmatprep.subr.bf16.mxu0 %v2454_v24  ;;  %v2605_v28 = vpop.eup %2604 }
 0x6bf   : > { %v1587_v33 = vmul.f32 %v2605_v28, %v2595_v3 }
 0x6d4   : > { %v1576_v25 = vpop.xlane.xlu1 %1575 }
 0x6d5   : > { %2606 = vrcp.f32 %v1576_v25 }
 0x6d6   : > { %2608 = vrcp.f32 %v1355_v14 }
 0x6d7   : > { %2610 = vrcp.f32 %v1358_v15 }
 0x6d8   : > { %2612 = vrcp.f32 %v1361_v16  ;;  %v2547_v26 = vpop.permute.xlu1 %2546 }
 0x6d9   : > { %v2549_v30 = vunpack.i.h.bf16 %v2547_v26  ;;  %v2548_v31 = vunpack.i.l.bf16 %v2547_v26 }
 0x6db   : > { %v2458_v37 = vpack.c.bf16 %v2549_v30, %v2548_v31 }
 0x6df   : > { %v2607_v29 = vpop.eup %2606 }
 0x6e0   : > { %v1585_v32 = vmul.f32 %v2607_v29, %v2597_v7  ;;  %v2609_v34 = vpop.eup %2608 }
 0x6e1   : > { %v2611_v36 = vpop.eup %2610  ;;  %v1365_v38 = vmul.f32 %v2609_v34, %v3039_v63 }
 0x6e2   : > { %2329 = vmatprep.mubr.msk.f32.mxu0 %vm1325_vm5, %v1585_v32  ;;  %v2613_v39 = vpop.eup %2612  ;;  %v1367_v40 = vmul.f32 %v2611_v36, %v3035_v53 }
 0x6e3   : > { %2330 = vmatmul.mubr.msk.f32.vlgmr.msra.gmra.mrb[12].mxu0 %vm1325_vm5, %v1587_v33  ;;  %v1369_v41 = vmul.f32 %v2613_v39, %v3043_v1 }
 0x6e4   : > { %2457 = vmatpush3.bf16.msra.mxu0 %v2454_v24  ;;  %2336 = vmatprep.mubr.msk.f32.mxu0 %vm1325_vm5, %v1363_v35 }
 0x6e5   : > { %2459 = vmatprep.subr.bf16.mxu0 %v2458_v37 }
 0x6e7   : > { %2337 = vmatmul.mubr.msk.f32.vlgmr.msra.gmra.mrb[10].mxu0 %vm1325_vm5, %v1365_v38 }
 0x6e8   : > { %2461 = vmatpush3.bf16.msra.mxu0 %v2458_v37  ;;  %2343 = vmatprep.mubr.msk.f32.mxu0 %vm1325_vm5, %v1367_v40 }
 0x6eb   : > { %2344 = vmatmul.mubr.msk.f32.vlgmr.msra.gmra.mrb[12].mxu0 %vm1325_vm5, %v1369_v41 }
 0x7ba   : > { %v2338_v42 = vpop.f32.mrb[10].mxu0 }
 0x7bb   : > { %v1937_v43 = vmul.f32 0.3, %v2338_v42  ;;  %v1840_v44 = vpop.f32.mrb[11].mxu0 }
 0x7bc   : > { %v1936_v46 = vmul.f32 0.3, %v1840_v44 }
 0x7bd   : > { %v1945_v48 = vadd.f32 %v1941_v45, %v1937_v43 }
 0x7be   : > { %v1944_v50 = vadd.f32 %v1940_v49, %v1936_v46  ;;  %v2345_v51 = vpop.f32.mrb[12].mxu0 }
 0x7bf   : > { %1949 = vst.msk [vmem:[%s2856_s12 + $0x8] sm:$0xff] %vm506_vm1, %v1945_v48  ;;  %v1939_v52 = vmul.f32 0.3, %v2345_v51  ;;  %v1927_v53 = vpop.f32.mrb[13].mxu0 }
 0x7c0   : > { %1948 = vst.msk [vmem:[%s2856_s12] sm:$0xff] %vm506_vm1, %v1944_v50  ;;  %v1938_v57 = vmul.f32 0.3, %v1927_v53 }
 0x7c1   : > { %v1947_v58 = vadd.f32 %v1943_v54, %v1939_v52 }
 0x7c2   : > { %v1946_v60 = vadd.f32 %v1942_v59, %v1938_v57 }
 0x7c3   : > { %1951 = vst.msk [vmem:[%s2856_s12 + $0x18] sm:$0xff] %vm506_vm1, %v1947_v58 }
 0x7c4   : > { %1950 = vst.msk [vmem:[%s2856_s12 + $0x10] sm:$0xff] %vm506_vm1, %v1946_v60 }
 0x7c5   : > { %2627 = shalt.err (!%p2624_p3)
}
 0x7c6   : > { %s2628_s12 = scalar_lea.hbm %s3081_s26, 512  ;;  %s2632_s22 = scalar_lea.hbm %s3143_s11, 1024 }
 0x7c7   : > { %p2629_p4 = scmp.ne.s32.totalorder %s3081_s26, %s2628_s12  ;;  %p2633_p9 = scmp.lt.u32.totalorder %s3081_s26, %s3143_s11 }
 0x7c8   : > { %p2634_p10 = scmp.lt.u32.totalorder %s2632_s22, %s2628_s12  ;;  %p2636_p12 = scmp.lt.u32.totalorder %s2628_s12, %s3081_s26 }
 0x7c9   : > { %p2630_p7 = pnand %p2629_p4, %p2782_p5 }
 0x7ca   : > { %p2635_p11 = por %p2634_p10, %p2633_p9 }
 0x7cb   : > { %p2631_p8 = pneg %p2630_p7 }
 0x7cc   : > { %p2637_p13 = por %p2636_p12, %p2635_p11 }
 0x7ce   : > { %p2638_p0 = pnand %p2637_p13, %p2631_p8 }
 0x7d0   : > { %2641 = shalt.err (!%p2638_p0)
}
 0x7d1   : > { %s2682_s29 = smov 128   ;;  %s2683_s13 = smov 8  }
 0x7d2   : > { %2466 = dma.vmem_to_hbm [thread:$0]  (%p2782_p5), %s3083_s16, 512, %s3081_s26, %s3091_s25, %s2682_s29, %s2682_s29, %s2683_s13  }
 0x7d3 PF: > { %p2472_p1 = scmp.ge.s32.totalorder %s2676_s20, 2  ;;  %s1982_s14 = sand.u32 1, %s2664_s17  }
 0x7d4   : > { %s1983_s12 = scalar_lea.sflag [#allocation3], %s1982_s14 }
 0x7d5   : > { %p2469_p2 = pnand %p2472_p1, %p2786_p6 }
 0x7d7   : > { %2659 = dma.done.wait (!%p2469_p2), %s1983_s12, 512  }
 0x7d8   : > { %2661 = vsyncadd (!%p2469_p2), %s1983_s12, 4294966784  ;;  %s3151_s24 = sld [smem:[#allocation5_spill]]  ;;  %p21_p3 = scmp.ge.s32.totalorder %s2769_s23, 4  }
 0x7d9   : > { %s3152_s17 = smov %s2668_s18  ;;  %s3153_s18 = smov %s2672_s19 }
 0x7da   : > { %s3155_s20 = smov %s2769_s23  ;;  %23 = sbr.rel (!%p21_p3) target bundleno = 3 (0x3), region = 99 }
 0x7de   : > { %s3154_s19 = smov %s3151_s24 }
 0x7e1   :  { %1988 = vsyncpa [#allocation3], 1 }
 0x7e2   :  { %1990 = vsyncpa [#allocation3 + $0x1], 1 }

</bundles_post_ra>
